<compile_context>
chip_gen: v7x
topology: tpu7x:2x2x1
jax: 0.10.0
libtpu: 0.0.40
codegen_flags: <defaults>
</compile_context>

<pallas_src>
import functools

import jax
import jax.numpy as jnp
import numpy as np
from jax import lax
from jax.experimental import pallas as pl
from jax.experimental.pallas import tpu as pltpu

EMB_DIM = 32          # logical embedding width (module hyper-parameter)
D_PAD = 128           # lane-dense padded width used inside the kernel
NUM_LAYERS = 2
CHUNK = 8             # edges per inner step (one 8-sublane vreg of messages)
NUM_ATOM_FEATS = 3    # synthetic stand-in for OGB's 9 atom features
NUM_BOND_FEATS = 3
ATOM_VOCABS = (13, 5, 7)
BOND_VOCABS = (6, 4, 3)
BN_EPS = 1e-5


def _round_up(x, m):
    return (x + m - 1) // m * m


# ----------------------------- Pallas kernel --------------------------------
def _gnn_node_kernel(num_layers, e_pad,
                     row_ref, col_ref, opeps_ref,                     # SMEM
                     h0_ref, ee_ref, w1_ref, t1_ref, w2_ref, t2_ref,  # VMEM
                     o_ref,                                           # output
                     h_scr, agg_scr):                                 # scratch
    n_pad = agg_scr.shape[0]
    num_chunks = e_pad // CHUNK
    node_iota = lax.broadcasted_iota(jnp.int32, (n_pad, CHUNK), 0)
    edge_iota = lax.broadcasted_iota(jnp.int32, (n_pad, CHUNK), 1)

    for layer in range(num_layers):                     # static unroll (L=2)
        src = h0_ref if layer == 0 else h_scr           # gather source
        dst = o_ref if layer == num_layers - 1 else h_scr

        # accumulator starts at (1 + eps) * x  (folds the old h_pre pass)
        agg_scr[...] = opeps_ref[layer] * src[...]

        ee_off = layer * e_pad

        # chunked GIN message + MXU one-hot scatter-add aggregation
        @pl.loop(0, num_chunks)
        def _(c):
            ebase = pl.multiple_of(c * CHUNK, CHUNK)

            # contiguous, aligned (CHUNK, 128) edge-embedding block
            ee_chunk = ee_ref[
                pl.ds(pl.multiple_of(ee_off + c * CHUNK, CHUNK), CHUNK), :]

            # CHUNK independent source-row gathers (statically unrolled)
            x_j = jnp.concatenate(
                [src[pl.ds(row_ref[ebase + i], 1), :] for i in range(CHUNK)],
                axis=0)                                     # (CHUNK, 128)

            msg = jnp.maximum(x_j + ee_chunk, 0.0)          # (CHUNK, 128)

            # one-hot (n_pad, CHUNK) destination matrix; duplicate columns are
            # summed by the matmul, so the scatter-add is order-safe.
            onehot = jnp.zeros((n_pad, CHUNK), jnp.float32)
            for i in range(CHUNK):
                hit = (edge_iota == i) & (node_iota == col_ref[ebase + i])
                onehot = jnp.where(hit, 1.0, onehot)

            agg_scr[...] += jnp.dot(onehot, msg,
                                    preferred_element_type=jnp.float32)

        # GIN MLP with BatchNorms + biases pre-folded into W', T'
        z = jnp.dot(agg_scr[...], w1_ref[layer],
                    preferred_element_type=jnp.float32) + t1_ref[layer]
        z = jnp.maximum(z, 0.0)
        z = jnp.dot(z, w2_ref[layer],
                    preferred_element_type=jnp.float32) + t2_ref[layer]
        if layer != num_layers - 1:                     # ReLU except last layer
            z = jnp.maximum(z, 0.0)
        # F.dropout is identity in eval mode
        dst[...] = z


def _fused_gnn_call(row, col, one_plus_eps, h0_pad, ee_pad, w1s, t1s, w2s, t2s,
                    *, num_layers, e_pad):
    n_pad, d_pad = h0_pad.shape
    vmem = pl.BlockSpec(memory_space=pltpu.MemorySpace.VMEM)
    smem = pl.BlockSpec(memory_space=pltpu.MemorySpace.SMEM)

    num_chunks = num_layers * (e_pad // CHUNK)
    flops = (num_layers * 4 * n_pad * d_pad * d_pad          # two GEMMs / layer
             + num_chunks * 2 * n_pad * CHUNK * d_pad        # one-hot scatters
             + num_layers * 3 * e_pad * d_pad)               # message VPU work
    bytes_accessed = 4 * (h0_pad.size + ee_pad.size + w1s.size + t1s.size
                          + w2s.size + t2s.size + n_pad * d_pad
                          + 2 * e_pad + num_layers)

    # resident VMEM: h0 + out + 2 scratch + ee + weights (+ headroom)
    resident = 4 * (4 * n_pad * d_pad + ee_pad.size
                    + w1s.size + w2s.size + t1s.size + t2s.size)
    vmem_limit = int(min(64 << 20, max(2 * resident, 8 << 20)))

    kernel = functools.partial(_gnn_node_kernel, num_layers, e_pad)
    return pl.pallas_call(
        kernel,
        out_shape=jax.ShapeDtypeStruct((n_pad, d_pad), jnp.float32),
        in_specs=[smem, smem, smem, vmem, vmem, vmem, vmem, vmem, vmem],
        out_specs=vmem,
        scratch_shapes=[pltpu.VMEM((n_pad, d_pad), jnp.float32),
                        pltpu.VMEM((n_pad, d_pad), jnp.float32)],
        compiler_params=pltpu.CompilerParams(vmem_limit_bytes=vmem_limit),
        cost_estimate=pl.CostEstimate(flops=flops, transcendentals=0,
                                      bytes_accessed=bytes_accessed),
    )(row, col, one_plus_eps, h0_pad, ee_pad, w1s, t1s, w2s, t2s)


# --------------------------- parameter init (glue) ---------------------------
def init_params(key):
    params = {'atom_emb': [], 'layers': []}
    for v in ATOM_VOCABS:
        key, k = jax.random.split(key)
        params['atom_emb'].append(0.1 * jax.random.normal(k, (v, EMB_DIM), jnp.float32))

    def make_bn(key):
        key, kg, kb, km, kv = jax.random.split(key, 5)
        bn = {'g': 1.0 + 0.1 * jax.random.normal(kg, (EMB_DIM,), jnp.float32),
              'b': 0.1 * jax.random.normal(kb, (EMB_DIM,), jnp.float32),
              'm': 0.1 * jax.random.normal(km, (EMB_DIM,), jnp.float32),
              'v': 0.5 + jax.random.uniform(kv, (EMB_DIM,), jnp.float32)}
        return key, bn

    for _ in range(NUM_LAYERS):
        lp = {}
        key, k1, k2, k3, k4 = jax.random.split(key, 5)
        # GIN MLP linears (stored transposed: applied as x @ W + b)
        lp['w1'] = 0.1 * jax.random.normal(k1, (EMB_DIM, EMB_DIM), jnp.float32)
        lp['b1'] = 0.05 * jax.random.normal(k2, (EMB_DIM,), jnp.float32)
        lp['w2'] = 0.1 * jax.random.normal(k3, (EMB_DIM, EMB_DIM), jnp.float32)
        lp['b2'] = 0.05 * jax.random.normal(k4, (EMB_DIM,), jnp.float32)
        key, lp['bn1'] = make_bn(key)    # BatchNorm1d inside the GIN MLP
        key, lp['bn2'] = make_bn(key)    # outer BatchNorm1d of GNNNode
        lp['eps'] = jnp.zeros((), jnp.float32)     # torch init: 0
        lp['bond_emb'] = []
        for v in BOND_VOCABS:
            key, kb2 = jax.random.split(key)
            lp['bond_emb'].append(0.1 * jax.random.normal(kb2, (v, EMB_DIM), jnp.float32))
        params['layers'].append(lp)
    return params


def _fold_bn(bn):
    scale = bn['g'] / jnp.sqrt(bn['v'] + BN_EPS)
    shift = bn['b'] - bn['m'] * scale
    return scale, shift


# ----------------------------- forward wrappers ------------------------------
@jax.jit
def gnn_node_forward(params, x_feat, edge_index, edge_attr):
    n = x_feat.shape[0]
    e = edge_attr.shape[0]
    n_pad = _round_up(n + 1, 8)          # +1 guarantees a "dead" row for pad edges
    e_pad = _round_up(max(e, CHUNK), CHUNK)
    pd = D_PAD - EMB_DIM
    dead = n                             # pad edges gather from / scatter to here

    # AtomEncoder: sum of per-feature embedding lookups (fused under this jit)
    h0 = sum(params['atom_emb'][i][x_feat[:, i]] for i in range(NUM_ATOM_FEATS))
    h0_pad = jnp.pad(h0, ((0, n_pad - n), (0, pd)))

    row = jnp.full((e_pad,), dead, jnp.int32).at[:e].set(
        edge_index[0].astype(jnp.int32))
    col = jnp.full((e_pad,), dead, jnp.int32).at[:e].set(
        edge_index[1].astype(jnp.int32))

    ee_layers, w1s, t1s, w2s, t2s, opeps = [], [], [], [], [], []
    for lp in params['layers']:
        # per-layer BondEncoder embedding sum
        ee = sum(lp['bond_emb'][i][edge_attr[:, i]] for i in range(NUM_BOND_FEATS))
        # TODO(synk): store/stream ee in bf16 on v6e/v7x to halve VMEM/HBM bytes.
        ee_layers.append(jnp.pad(ee, ((0, e_pad - e), (0, pd))))
        # fold eval-mode BatchNorms + biases into the linears (host side)
        s1, sh1 = _fold_bn(lp['bn1'])
        s2, sh2 = _fold_bn(lp['bn2'])
        w1f = lp['w1'] * s1[None, :]
        t1f = lp['b1'] * s1 + sh1
        w2f = lp['w2'] * s2[None, :]
        t2f = lp['b2'] * s2 + sh2
        w1s.append(jnp.pad(w1f, ((0, pd), (0, pd))))
        w2s.append(jnp.pad(w2f, ((0, pd), (0, pd))))
        t1s.append(jnp.pad(t1f, (0, pd)).reshape(1, D_PAD))
        t2s.append(jnp.pad(t2f, (0, pd)).reshape(1, D_PAD))
        opeps.append(1.0 + lp['eps'])

    ee_pad = jnp.concatenate(ee_layers, axis=0)            # [L*e_pad, D_PAD]
    w1s = jnp.stack(w1s)                                   # [L, D_PAD, D_PAD]
    w2s = jnp.stack(w2s)
    t1s = jnp.stack(t1s)                                   # [L, 1, D_PAD]
    t2s = jnp.stack(t2s)
    one_plus_eps = jnp.stack(opeps).astype(jnp.float32)    # [L]

    out_pad = _fused_gnn_call(row, col, one_plus_eps, h0_pad, ee_pad,
                              w1s, t1s, w2s, t2s,
                              num_layers=NUM_LAYERS, e_pad=e_pad)
    return out_pad[:n, :EMB_DIM]                           # JK == 'last'


def gnn_node_forward_ref(params, x_feat, edge_index, edge_attr):
    """Pure-JAX reference (same eval-mode semantics), unfolded BN/bias."""
    n = x_feat.shape[0]
    h = sum(params['atom_emb'][i][x_feat[:, i]] for i in range(NUM_ATOM_FEATS))
    row, col = edge_index[0], edge_index[1]
    for layer in range(NUM_LAYERS):
        lp = params['layers'][layer]
        ee = sum(lp['bond_emb'][i][edge_attr[:, i]] for i in range(NUM_BOND_FEATS))
        msg = jnp.maximum(h[row] + ee, 0.0)
        agg = jnp.zeros((n, EMB_DIM), jnp.float32).at[col].add(msg)
        z = (1.0 + lp['eps']) * h + agg
        z = z @ lp['w1'] + lp['b1']
        bn1 = lp['bn1']
        z = (z - bn1['m']) / jnp.sqrt(bn1['v'] + BN_EPS) * bn1['g'] + bn1['b']
        z = jnp.maximum(z, 0.0)
        z = z @ lp['w2'] + lp['b2']
        bn2 = lp['bn2']
        z = (z - bn2['m']) / jnp.sqrt(bn2['v'] + BN_EPS) * bn2['g'] + bn2['b']
        if layer != NUM_LAYERS - 1:
            z = jnp.maximum(z, 0.0)
        h = z
    return h


# ------------------------------------ main -----------------------------------
if __name__ == "__main__":
    key = jax.random.PRNGKey(0)
    key, kp, kx, ke, kb = jax.random.split(key, 5)

    N, E = 16, 32   # nodes, edges (small synthetic graph)
    params = init_params(kp)

    # synthetic batched_data: categorical node / edge features + edge_index
    x_feat = jnp.stack(
        [jax.random.randint(jax.random.fold_in(kx, i), (N,), 0, ATOM_VOCABS[i])
         for i in range(NUM_ATOM_FEATS)], axis=1).astype(jnp.int32)      # [N, 3]
    edge_attr = jnp.stack(
        [jax.random.randint(jax.random.fold_in(kb, i), (E,), 0, BOND_VOCABS[i])
         for i in range(NUM_BOND_FEATS)], axis=1).astype(jnp.int32)      # [E, 3]
    edge_index = jax.random.randint(ke, (2, E), 0, N).astype(jnp.int32)  # [2, E]

    out = jax.block_until_ready(
        gnn_node_forward(params, x_feat, edge_index, edge_attr))
    ref = jax.block_until_ready(
        gnn_node_forward_ref(params, x_feat, edge_index, edge_attr))
    np.testing.assert_allclose(np.asarray(out), np.asarray(ref),
                               rtol=1e-4, atol=1e-4)

    print("KERNEL_OK")
</pallas_src>

<mosaic_0001>
module attributes {stable_mosaic.version = 11 : i64} {
  func.func @_gnn_node_kernel(%arg0: memref<32xi32, #tpu.memory_space<smem>>, %arg1: memref<32xi32, #tpu.memory_space<smem>>, %arg2: memref<2xf32, #tpu.memory_space<smem>>, %arg3: memref<24x128xf32, #tpu.memory_space<vmem>>, %arg4: memref<64x128xf32, #tpu.memory_space<vmem>>, %arg5: memref<2x128x128xf32, #tpu.memory_space<vmem>>, %arg6: memref<2x1x128xf32, #tpu.memory_space<vmem>>, %arg7: memref<2x128x128xf32, #tpu.memory_space<vmem>>, %arg8: memref<2x1x128xf32, #tpu.memory_space<vmem>>, %arg9: memref<24x128xf32, #tpu.memory_space<vmem>>, %arg10: memref<24x128xf32, #tpu.memory_space<vmem>>, %arg11: memref<24x128xf32, #tpu.memory_space<vmem>>) attributes {dimension_semantics = [], scalar_prefetch = 0 : i64, scratch_operands = 2 : i64, tpu.core_type = #tpu.core_type<tc>} {
    %0 = tpu.iota {dimensions = array<i32: 0>} : vector<24x8xi32>
    %1 = tpu.iota {dimensions = array<i32: 1>} : vector<24x8xi32>
    %c0 = arith.constant 0 : index
    %2 = memref.load %arg2[%c0] : memref<2xf32, #tpu.memory_space<smem>>
    %c0_0 = arith.constant 0 : index
    %c0_1 = arith.constant 0 : index
    %3 = vector.load %arg3[%c0_0, %c0_1] : memref<24x128xf32, #tpu.memory_space<vmem>>, vector<24x128xf32>
    %4 = vector.broadcast %2 : f32 to vector<24x128xf32>
    %5 = arith.mulf %4, %3 : vector<24x128xf32>
    %c0_2 = arith.constant 0 : index
    %c0_3 = arith.constant 0 : index
    %6 = vector.load %arg11[%c0_2, %c0_3] : memref<24x128xf32, #tpu.memory_space<vmem>>, vector<24x128xf32>
    tpu.vector_store %arg11[%c0_2, %c0_3], %5 {strides = array<i32>} : memref<24x128xf32, #tpu.memory_space<vmem>>, vector<24x128xf32>,
    %c0_i32 = arith.constant 0 : i32
    %c4_i32 = arith.constant 4 : i32
    %7 = arith.addi %c0_i32, %c4_i32 : i32
    %c1_i32 = arith.constant 1 : i32
    scf.for %arg12 = %c0_i32 to %7 step %c1_i32  : i32 {
      %c1_i32_51 = arith.constant 1 : i32
      %52 = arith.muli %arg12, %c1_i32_51 : i32
      %c0_i32_52 = arith.constant 0 : i32
      %53 = arith.addi %c0_i32_52, %52 : i32
      %c8_i32 = arith.constant 8 : i32
      %54 = arith.muli %53, %c8_i32 : i32
      %55 = tpu.assume_multiple %54, 8 : i32
      %c8_i32_53 = arith.constant 8 : i32
      %56 = arith.muli %53, %c8_i32_53 : i32
      %c0_i32_54 = arith.constant 0 : i32
      %57 = arith.addi %c0_i32_54, %56 : i32
      %58 = tpu.assume_multiple %57, 8 : i32
      %59 = arith.index_cast %58 : i32 to index
      %c0_55 = arith.constant 0 : index
      %60 = vector.load %arg4[%59, %c0_55] : memref<64x128xf32, #tpu.memory_space<vmem>>, vector<8x128xf32>
      %c0_i32_56 = arith.constant 0 : i32
      %61 = arith.addi %55, %c0_i32_56 : i32
      %62 = arith.index_cast %61 : i32 to index
      %63 = memref.load %arg0[%62] : memref<32xi32, #tpu.memory_space<smem>>
      %64 = arith.index_cast %63 : i32 to index
      %c0_57 = arith.constant 0 : index
      %65 = vector.load %arg3[%64, %c0_57] : memref<24x128xf32, #tpu.memory_space<vmem>>, vector<1x128xf32>
      %c1_i32_58 = arith.constant 1 : i32
      %66 = arith.addi %55, %c1_i32_58 : i32
      %67 = arith.index_cast %66 : i32 to index
      %68 = memref.load %arg0[%67] : memref<32xi32, #tpu.memory_space<smem>>
      %69 = arith.index_cast %68 : i32 to index
      %c0_59 = arith.constant 0 : index
      %70 = vector.load %arg3[%69, %c0_59] : memref<24x128xf32, #tpu.memory_space<vmem>>, vector<1x128xf32>
      %c2_i32 = arith.constant 2 : i32
      %71 = arith.addi %55, %c2_i32 : i32
      %72 = arith.index_cast %71 : i32 to index
      %73 = memref.load %arg0[%72] : memref<32xi32, #tpu.memory_space<smem>>
      %74 = arith.index_cast %73 : i32 to index
      %c0_60 = arith.constant 0 : index
      %75 = vector.load %arg3[%74, %c0_60] : memref<24x128xf32, #tpu.memory_space<vmem>>, vector<1x128xf32>
      %c3_i32 = arith.constant 3 : i32
      %76 = arith.addi %55, %c3_i32 : i32
      %77 = arith.index_cast %76 : i32 to index
      %78 = memref.load %arg0[%77] : memref<32xi32, #tpu.memory_space<smem>>
      %79 = arith.index_cast %78 : i32 to index
      %c0_61 = arith.constant 0 : index
      %80 = vector.load %arg3[%79, %c0_61] : memref<24x128xf32, #tpu.memory_space<vmem>>, vector<1x128xf32>
      %c4_i32_62 = arith.constant 4 : i32
      %81 = arith.addi %55, %c4_i32_62 : i32
      %82 = arith.index_cast %81 : i32 to index
      %83 = memref.load %arg0[%82] : memref<32xi32, #tpu.memory_space<smem>>
      %84 = arith.index_cast %83 : i32 to index
      %c0_63 = arith.constant 0 : index
      %85 = vector.load %arg3[%84, %c0_63] : memref<24x128xf32, #tpu.memory_space<vmem>>, vector<1x128xf32>
      %c5_i32 = arith.constant 5 : i32
      %86 = arith.addi %55, %c5_i32 : i32
      %87 = arith.index_cast %86 : i32 to index
      %88 = memref.load %arg0[%87] : memref<32xi32, #tpu.memory_space<smem>>
      %89 = arith.index_cast %88 : i32 to index
      %c0_64 = arith.constant 0 : index
      %90 = vector.load %arg3[%89, %c0_64] : memref<24x128xf32, #tpu.memory_space<vmem>>, vector<1x128xf32>
      %c6_i32 = arith.constant 6 : i32
      %91 = arith.addi %55, %c6_i32 : i32
      %92 = arith.index_cast %91 : i32 to index
      %93 = memref.load %arg0[%92] : memref<32xi32, #tpu.memory_space<smem>>
      %94 = arith.index_cast %93 : i32 to index
      %c0_65 = arith.constant 0 : index
      %95 = vector.load %arg3[%94, %c0_65] : memref<24x128xf32, #tpu.memory_space<vmem>>, vector<1x128xf32>
      %c7_i32 = arith.constant 7 : i32
      %96 = arith.addi %55, %c7_i32 : i32
      %97 = arith.index_cast %96 : i32 to index
      %98 = memref.load %arg0[%97] : memref<32xi32, #tpu.memory_space<smem>>
      %99 = arith.index_cast %98 : i32 to index
      %c0_66 = arith.constant 0 : index
      %100 = vector.load %arg3[%99, %c0_66] : memref<24x128xf32, #tpu.memory_space<vmem>>, vector<1x128xf32>
      %101 = tpu.concatenate %65, %70, %75, %80, %85, %90, %95, %100 in 0 : vector<1x128xf32>, vector<1x128xf32>, vector<1x128xf32>, vector<1x128xf32>, vector<1x128xf32>, vector<1x128xf32>, vector<1x128xf32>, vector<1x128xf32> -> vector<8x128xf32>
      %102 = arith.addf %101, %60 : vector<8x128xf32>
      %cst_67 = arith.constant 0.000000e+00 : f32
      %103 = vector.broadcast %cst_67 : f32 to vector<8x128xf32>
      %104 = arith.maximumf %102, %103 : vector<8x128xf32>
      %cst_68 = arith.constant 0.000000e+00 : f32
      %105 = vector.broadcast %cst_68 : f32 to vector<24x8xf32>
      %c0_i32_69 = arith.constant 0 : i32
      %106 = vector.broadcast %c0_i32_69 : i32 to vector<24x8xi32>
      %107 = arith.cmpi eq, %1, %106 : vector<24x8xi32>
      %c0_i32_70 = arith.constant 0 : i32
      %108 = arith.addi %55, %c0_i32_70 : i32
      %109 = arith.index_cast %108 : i32 to index
      %110 = memref.load %arg1[%109] : memref<32xi32, #tpu.memory_space<smem>>
      %111 = vector.broadcast %110 : i32 to vector<24x8xi32>
      %112 = arith.cmpi eq, %0, %111 : vector<24x8xi32>
      %113 = arith.andi %107, %112 : vector<24x8xi1>
      %cst_71 = arith.constant 1.000000e+00 : f32
      %114 = vector.broadcast %cst_71 : f32 to vector<24x8xf32>
      %115 = arith.select %113, %114, %105 : vector<24x8xi1>, vector<24x8xf32>
      %c1_i32_72 = arith.constant 1 : i32
      %116 = vector.broadcast %c1_i32_72 : i32 to vector<24x8xi32>
      %117 = arith.cmpi eq, %1, %116 : vector<24x8xi32>
      %c1_i32_73 = arith.constant 1 : i32
      %118 = arith.addi %55, %c1_i32_73 : i32
      %119 = arith.index_cast %118 : i32 to index
      %120 = memref.load %arg1[%119] : memref<32xi32, #tpu.memory_space<smem>>
      %121 = vector.broadcast %120 : i32 to vector<24x8xi32>
      %122 = arith.cmpi eq, %0, %121 : vector<24x8xi32>
      %123 = arith.andi %117, %122 : vector<24x8xi1>
      %cst_74 = arith.constant 1.000000e+00 : f32
      %124 = vector.broadcast %cst_74 : f32 to vector<24x8xf32>
      %125 = arith.select %123, %124, %115 : vector<24x8xi1>, vector<24x8xf32>
      %c2_i32_75 = arith.constant 2 : i32
      %126 = vector.broadcast %c2_i32_75 : i32 to vector<24x8xi32>
      %127 = arith.cmpi eq, %1, %126 : vector<24x8xi32>
      %c2_i32_76 = arith.constant 2 : i32
      %128 = arith.addi %55, %c2_i32_76 : i32
      %129 = arith.index_cast %128 : i32 to index
      %130 = memref.load %arg1[%129] : memref<32xi32, #tpu.memory_space<smem>>
      %131 = vector.broadcast %130 : i32 to vector<24x8xi32>
      %132 = arith.cmpi eq, %0, %131 : vector<24x8xi32>
      %133 = arith.andi %127, %132 : vector<24x8xi1>
      %cst_77 = arith.constant 1.000000e+00 : f32
      %134 = vector.broadcast %cst_77 : f32 to vector<24x8xf32>
      %135 = arith.select %133, %134, %125 : vector<24x8xi1>, vector<24x8xf32>
      %c3_i32_78 = arith.constant 3 : i32
      %136 = vector.broadcast %c3_i32_78 : i32 to vector<24x8xi32>
      %137 = arith.cmpi eq, %1, %136 : vector<24x8xi32>
      %c3_i32_79 = arith.constant 3 : i32
      %138 = arith.addi %55, %c3_i32_79 : i32
      %139 = arith.index_cast %138 : i32 to index
      %140 = memref.load %arg1[%139] : memref<32xi32, #tpu.memory_space<smem>>
      %141 = vector.broadcast %140 : i32 to vector<24x8xi32>
      %142 = arith.cmpi eq, %0, %141 : vector<24x8xi32>
      %143 = arith.andi %137, %142 : vector<24x8xi1>
      %cst_80 = arith.constant 1.000000e+00 : f32
      %144 = vector.broadcast %cst_80 : f32 to vector<24x8xf32>
      %145 = arith.select %143, %144, %135 : vector<24x8xi1>, vector<24x8xf32>
      %c4_i32_81 = arith.constant 4 : i32
      %146 = vector.broadcast %c4_i32_81 : i32 to vector<24x8xi32>
      %147 = arith.cmpi eq, %1, %146 : vector<24x8xi32>
      %c4_i32_82 = arith.constant 4 : i32
      %148 = arith.addi %55, %c4_i32_82 : i32
      %149 = arith.index_cast %148 : i32 to index
      %150 = memref.load %arg1[%149] : memref<32xi32, #tpu.memory_space<smem>>
      %151 = vector.broadcast %150 : i32 to vector<24x8xi32>
      %152 = arith.cmpi eq, %0, %151 : vector<24x8xi32>
      %153 = arith.andi %147, %152 : vector<24x8xi1>
      %cst_83 = arith.constant 1.000000e+00 : f32
      %154 = vector.broadcast %cst_83 : f32 to vector<24x8xf32>
      %155 = arith.select %153, %154, %145 : vector<24x8xi1>, vector<24x8xf32>
      %c5_i32_84 = arith.constant 5 : i32
      %156 = vector.broadcast %c5_i32_84 : i32 to vector<24x8xi32>
      %157 = arith.cmpi eq, %1, %156 : vector<24x8xi32>
      %c5_i32_85 = arith.constant 5 : i32
      %158 = arith.addi %55, %c5_i32_85 : i32
      %159 = arith.index_cast %158 : i32 to index
      %160 = memref.load %arg1[%159] : memref<32xi32, #tpu.memory_space<smem>>
      %161 = vector.broadcast %160 : i32 to vector<24x8xi32>
      %162 = arith.cmpi eq, %0, %161 : vector<24x8xi32>
      %163 = arith.andi %157, %162 : vector<24x8xi1>
      %cst_86 = arith.constant 1.000000e+00 : f32
      %164 = vector.broadcast %cst_86 : f32 to vector<24x8xf32>
      %165 = arith.select %163, %164, %155 : vector<24x8xi1>, vector<24x8xf32>
      %c6_i32_87 = arith.constant 6 : i32
      %166 = vector.broadcast %c6_i32_87 : i32 to vector<24x8xi32>
      %167 = arith.cmpi eq, %1, %166 : vector<24x8xi32>
      %c6_i32_88 = arith.constant 6 : i32
      %168 = arith.addi %55, %c6_i32_88 : i32
      %169 = arith.index_cast %168 : i32 to index
      %170 = memref.load %arg1[%169] : memref<32xi32, #tpu.memory_space<smem>>
      %171 = vector.broadcast %170 : i32 to vector<24x8xi32>
      %172 = arith.cmpi eq, %0, %171 : vector<24x8xi32>
      %173 = arith.andi %167, %172 : vector<24x8xi1>
      %cst_89 = arith.constant 1.000000e+00 : f32
      %174 = vector.broadcast %cst_89 : f32 to vector<24x8xf32>
      %175 = arith.select %173, %174, %165 : vector<24x8xi1>, vector<24x8xf32>
      %c7_i32_90 = arith.constant 7 : i32
      %176 = vector.broadcast %c7_i32_90 : i32 to vector<24x8xi32>
      %177 = arith.cmpi eq, %1, %176 : vector<24x8xi32>
      %c7_i32_91 = arith.constant 7 : i32
      %178 = arith.addi %55, %c7_i32_91 : i32
      %179 = arith.index_cast %178 : i32 to index
      %180 = memref.load %arg1[%179] : memref<32xi32, #tpu.memory_space<smem>>
      %181 = vector.broadcast %180 : i32 to vector<24x8xi32>
      %182 = arith.cmpi eq, %0, %181 : vector<24x8xi32>
      %183 = arith.andi %177, %182 : vector<24x8xi1>
      %cst_92 = arith.constant 1.000000e+00 : f32
      %184 = vector.broadcast %cst_92 : f32 to vector<24x8xf32>
      %185 = arith.select %183, %184, %175 : vector<24x8xi1>, vector<24x8xf32>
      %c0_93 = arith.constant 0 : index
      %c0_94 = arith.constant 0 : index
      %186 = vector.load %arg11[%c0_93, %c0_94] : memref<24x128xf32, #tpu.memory_space<vmem>>, vector<24x128xf32>
      %cst_95 = arith.constant dense<0.000000e+00> : vector<24x128xf32>
      %187 = tpu.matmul %185, %104, %cst_95 {dimension_numbers = #tpu.dot_dimension_numbers<[1], [0], [0], [1], [0, 0, 1, 1], [], []>} : vector<24x8xf32>, vector<8x128xf32>, vector<24x128xf32> -> vector<24x128xf32>
      %188 = arith.addf %186, %187 : vector<24x128xf32>
      %c0_96 = arith.constant 0 : index
      %c0_97 = arith.constant 0 : index
      %189 = vector.load %arg11[%c0_96, %c0_97] : memref<24x128xf32, #tpu.memory_space<vmem>>, vector<24x128xf32>
      tpu.vector_store %arg11[%c0_96, %c0_97], %188 {strides = array<i32>} : memref<24x128xf32, #tpu.memory_space<vmem>>, vector<24x128xf32>,
    }
    %c4_i32_4 = arith.constant 4 : i32
    %c0_5 = arith.constant 0 : index
    %c0_6 = arith.constant 0 : index
    %8 = vector.load %arg11[%c0_5, %c0_6] : memref<24x128xf32, #tpu.memory_space<vmem>>, vector<24x128xf32>
    %c0_7 = arith.constant 0 : index
    %c0_8 = arith.constant 0 : index
    %c0_9 = arith.constant 0 : index
    %9 = vector.load %arg5[%c0_7, %c0_8, %c0_9] : memref<2x128x128xf32, #tpu.memory_space<vmem>>, vector<1x128x128xf32>
    %10 = vector.shape_cast %9 : vector<1x128x128xf32> to vector<128x128xf32>
    %cst = arith.constant dense<0.000000e+00> : vector<24x128xf32>
    %11 = tpu.matmul %8, %10, %cst {dimension_numbers = #tpu.dot_dimension_numbers<[1], [0], [0], [1], [0, 0, 1, 1], [], []>} : vector<24x128xf32>, vector<128x128xf32>, vector<24x128xf32> -> vector<24x128xf32>
    %c0_10 = arith.constant 0 : index
    %c0_11 = arith.constant 0 : index
    %c0_12 = arith.constant 0 : index
    %12 = vector.load %arg6[%c0_10, %c0_11, %c0_12] : memref<2x1x128xf32, #tpu.memory_space<vmem>>, vector<1x1x128xf32>
    %13 = vector.shape_cast %12 : vector<1x1x128xf32> to vector<1x128xf32>
    %14 = vector.broadcast %13 : vector<1x128xf32> to vector<24x128xf32>
    %15 = arith.addf %11, %14 : vector<24x128xf32>
    %cst_13 = arith.constant 0.000000e+00 : f32
    %16 = vector.broadcast %cst_13 : f32 to vector<24x128xf32>
    %17 = arith.maximumf %15, %16 : vector<24x128xf32>
    %c0_14 = arith.constant 0 : index
    %c0_15 = arith.constant 0 : index
    %c0_16 = arith.constant 0 : index
    %18 = vector.load %arg7[%c0_14, %c0_15, %c0_16] : memref<2x128x128xf32, #tpu.memory_space<vmem>>, vector<1x128x128xf32>
    %19 = vector.shape_cast %18 : vector<1x128x128xf32> to vector<128x128xf32>
    %cst_17 = arith.constant dense<0.000000e+00> : vector<24x128xf32>
    %20 = tpu.matmul %17, %19, %cst_17 {dimension_numbers = #tpu.dot_dimension_numbers<[1], [0], [0], [1], [0, 0, 1, 1], [], []>} : vector<24x128xf32>, vector<128x128xf32>, vector<24x128xf32> -> vector<24x128xf32>
    %c0_18 = arith.constant 0 : index
    %c0_19 = arith.constant 0 : index
    %c0_20 = arith.constant 0 : index
    %21 = vector.load %arg8[%c0_18, %c0_19, %c0_20] : memref<2x1x128xf32, #tpu.memory_space<vmem>>, vector<1x1x128xf32>
    %22 = vector.shape_cast %21 : vector<1x1x128xf32> to vector<1x128xf32>
    %23 = vector.broadcast %22 : vector<1x128xf32> to vector<24x128xf32>
    %24 = arith.addf %20, %23 : vector<24x128xf32>
    %cst_21 = arith.constant 0.000000e+00 : f32
    %25 = vector.broadcast %cst_21 : f32 to vector<24x128xf32>
    %26 = arith.maximumf %24, %25 : vector<24x128xf32>
    %c0_22 = arith.constant 0 : index
    %c0_23 = arith.constant 0 : index
    %27 = vector.load %arg10[%c0_22, %c0_23] : memref<24x128xf32, #tpu.memory_space<vmem>>, vector<24x128xf32>
    tpu.vector_store %arg10[%c0_22, %c0_23], %26 {strides = array<i32>} : memref<24x128xf32, #tpu.memory_space<vmem>>, vector<24x128xf32>,
    %c1 = arith.constant 1 : index
    %28 = memref.load %arg2[%c1] : memref<2xf32, #tpu.memory_space<smem>>
    %c0_24 = arith.constant 0 : index
    %c0_25 = arith.constant 0 : index
    %29 = vector.load %arg10[%c0_24, %c0_25] : memref<24x128xf32, #tpu.memory_space<vmem>>, vector<24x128xf32>
    %30 = vector.broadcast %28 : f32 to vector<24x128xf32>
    %31 = arith.mulf %30, %29 : vector<24x128xf32>
    %c0_26 = arith.constant 0 : index
    %c0_27 = arith.constant 0 : index
    %32 = vector.load %arg11[%c0_26, %c0_27] : memref<24x128xf32, #tpu.memory_space<vmem>>, vector<24x128xf32>
    tpu.vector_store %arg11[%c0_26, %c0_27], %31 {strides = array<i32>} : memref<24x128xf32, #tpu.memory_space<vmem>>, vector<24x128xf32>,
    %c0_i32_28 = arith.constant 0 : i32
    %c4_i32_29 = arith.constant 4 : i32
    %33 = arith.addi %c0_i32_28, %c4_i32_29 : i32
    %c1_i32_30 = arith.constant 1 : i32
    scf.for %arg12 = %c0_i32_28 to %33 step %c1_i32_30  : i32 {
      %c1_i32_51 = arith.constant 1 : i32
      %52 = arith.muli %arg12, %c1_i32_51 : i32
      %c0_i32_52 = arith.constant 0 : i32
      %53 = arith.addi %c0_i32_52, %52 : i32
      %c8_i32 = arith.constant 8 : i32
      %54 = arith.muli %53, %c8_i32 : i32
      %55 = tpu.assume_multiple %54, 8 : i32
      %c8_i32_53 = arith.constant 8 : i32
      %56 = arith.muli %53, %c8_i32_53 : i32
      %c32_i32 = arith.constant 32 : i32
      %57 = arith.addi %c32_i32, %56 : i32
      %58 = tpu.assume_multiple %57, 8 : i32
      %59 = arith.index_cast %58 : i32 to index
      %c0_54 = arith.constant 0 : index
      %60 = vector.load %arg4[%59, %c0_54] : memref<64x128xf32, #tpu.memory_space<vmem>>, vector<8x128xf32>
      %c0_i32_55 = arith.constant 0 : i32
      %61 = arith.addi %55, %c0_i32_55 : i32
      %62 = arith.index_cast %61 : i32 to index
      %63 = memref.load %arg0[%62] : memref<32xi32, #tpu.memory_space<smem>>
      %64 = arith.index_cast %63 : i32 to index
      %c0_56 = arith.constant 0 : index
      %65 = vector.load %arg10[%64, %c0_56] : memref<24x128xf32, #tpu.memory_space<vmem>>, vector<1x128xf32>
      %c1_i32_57 = arith.constant 1 : i32
      %66 = arith.addi %55, %c1_i32_57 : i32
      %67 = arith.index_cast %66 : i32 to index
      %68 = memref.load %arg0[%67] : memref<32xi32, #tpu.memory_space<smem>>
      %69 = arith.index_cast %68 : i32 to index
      %c0_58 = arith.constant 0 : index
      %70 = vector.load %arg10[%69, %c0_58] : memref<24x128xf32, #tpu.memory_space<vmem>>, vector<1x128xf32>
      %c2_i32 = arith.constant 2 : i32
      %71 = arith.addi %55, %c2_i32 : i32
      %72 = arith.index_cast %71 : i32 to index
      %73 = memref.load %arg0[%72] : memref<32xi32, #tpu.memory_space<smem>>
      %74 = arith.index_cast %73 : i32 to index
      %c0_59 = arith.constant 0 : index
      %75 = vector.load %arg10[%74, %c0_59] : memref<24x128xf32, #tpu.memory_space<vmem>>, vector<1x128xf32>
      %c3_i32 = arith.constant 3 : i32
      %76 = arith.addi %55, %c3_i32 : i32
      %77 = arith.index_cast %76 : i32 to index
      %78 = memref.load %arg0[%77] : memref<32xi32, #tpu.memory_space<smem>>
      %79 = arith.index_cast %78 : i32 to index
      %c0_60 = arith.constant 0 : index
      %80 = vector.load %arg10[%79, %c0_60] : memref<24x128xf32, #tpu.memory_space<vmem>>, vector<1x128xf32>
      %c4_i32_61 = arith.constant 4 : i32
      %81 = arith.addi %55, %c4_i32_61 : i32
      %82 = arith.index_cast %81 : i32 to index
      %83 = memref.load %arg0[%82] : memref<32xi32, #tpu.memory_space<smem>>
      %84 = arith.index_cast %83 : i32 to index
      %c0_62 = arith.constant 0 : index
      %85 = vector.load %arg10[%84, %c0_62] : memref<24x128xf32, #tpu.memory_space<vmem>>, vector<1x128xf32>
      %c5_i32 = arith.constant 5 : i32
      %86 = arith.addi %55, %c5_i32 : i32
      %87 = arith.index_cast %86 : i32 to index
      %88 = memref.load %arg0[%87] : memref<32xi32, #tpu.memory_space<smem>>
      %89 = arith.index_cast %88 : i32 to index
      %c0_63 = arith.constant 0 : index
      %90 = vector.load %arg10[%89, %c0_63] : memref<24x128xf32, #tpu.memory_space<vmem>>, vector<1x128xf32>
      %c6_i32 = arith.constant 6 : i32
      %91 = arith.addi %55, %c6_i32 : i32
      %92 = arith.index_cast %91 : i32 to index
      %93 = memref.load %arg0[%92] : memref<32xi32, #tpu.memory_space<smem>>
      %94 = arith.index_cast %93 : i32 to index
      %c0_64 = arith.constant 0 : index
      %95 = vector.load %arg10[%94, %c0_64] : memref<24x128xf32, #tpu.memory_space<vmem>>, vector<1x128xf32>
      %c7_i32 = arith.constant 7 : i32
      %96 = arith.addi %55, %c7_i32 : i32
      %97 = arith.index_cast %96 : i32 to index
      %98 = memref.load %arg0[%97] : memref<32xi32, #tpu.memory_space<smem>>
      %99 = arith.index_cast %98 : i32 to index
      %c0_65 = arith.constant 0 : index
      %100 = vector.load %arg10[%99, %c0_65] : memref<24x128xf32, #tpu.memory_space<vmem>>, vector<1x128xf32>
      %101 = tpu.concatenate %65, %70, %75, %80, %85, %90, %95, %100 in 0 : vector<1x128xf32>, vector<1x128xf32>, vector<1x128xf32>, vector<1x128xf32>, vector<1x128xf32>, vector<1x128xf32>, vector<1x128xf32>, vector<1x128xf32> -> vector<8x128xf32>
      %102 = arith.addf %101, %60 : vector<8x128xf32>
      %cst_66 = arith.constant 0.000000e+00 : f32
      %103 = vector.broadcast %cst_66 : f32 to vector<8x128xf32>
      %104 = arith.maximumf %102, %103 : vector<8x128xf32>
      %cst_67 = arith.constant 0.000000e+00 : f32
      %105 = vector.broadcast %cst_67 : f32 to vector<24x8xf32>
      %c0_i32_68 = arith.constant 0 : i32
      %106 = vector.broadcast %c0_i32_68 : i32 to vector<24x8xi32>
      %107 = arith.cmpi eq, %1, %106 : vector<24x8xi32>
      %c0_i32_69 = arith.constant 0 : i32
      %108 = arith.addi %55, %c0_i32_69 : i32
      %109 = arith.index_cast %108 : i32 to index
      %110 = memref.load %arg1[%109] : memref<32xi32, #tpu.memory_space<smem>>
      %111 = vector.broadcast %110 : i32 to vector<24x8xi32>
      %112 = arith.cmpi eq, %0, %111 : vector<24x8xi32>
      %113 = arith.andi %107, %112 : vector<24x8xi1>
      %cst_70 = arith.constant 1.000000e+00 : f32
      %114 = vector.broadcast %cst_70 : f32 to vector<24x8xf32>
      %115 = arith.select %113, %114, %105 : vector<24x8xi1>, vector<24x8xf32>
      %c1_i32_71 = arith.constant 1 : i32
      %116 = vector.broadcast %c1_i32_71 : i32 to vector<24x8xi32>
      %117 = arith.cmpi eq, %1, %116 : vector<24x8xi32>
      %c1_i32_72 = arith.constant 1 : i32
      %118 = arith.addi %55, %c1_i32_72 : i32
      %119 = arith.index_cast %118 : i32 to index
      %120 = memref.load %arg1[%119] : memref<32xi32, #tpu.memory_space<smem>>
      %121 = vector.broadcast %120 : i32 to vector<24x8xi32>
      %122 = arith.cmpi eq, %0, %121 : vector<24x8xi32>
      %123 = arith.andi %117, %122 : vector<24x8xi1>
      %cst_73 = arith.constant 1.000000e+00 : f32
      %124 = vector.broadcast %cst_73 : f32 to vector<24x8xf32>
      %125 = arith.select %123, %124, %115 : vector<24x8xi1>, vector<24x8xf32>
      %c2_i32_74 = arith.constant 2 : i32
      %126 = vector.broadcast %c2_i32_74 : i32 to vector<24x8xi32>
      %127 = arith.cmpi eq, %1, %126 : vector<24x8xi32>
      %c2_i32_75 = arith.constant 2 : i32
      %128 = arith.addi %55, %c2_i32_75 : i32
      %129 = arith.index_cast %128 : i32 to index
      %130 = memref.load %arg1[%129] : memref<32xi32, #tpu.memory_space<smem>>
      %131 = vector.broadcast %130 : i32 to vector<24x8xi32>
      %132 = arith.cmpi eq, %0, %131 : vector<24x8xi32>
      %133 = arith.andi %127, %132 : vector<24x8xi1>
      %cst_76 = arith.constant 1.000000e+00 : f32
      %134 = vector.broadcast %cst_76 : f32 to vector<24x8xf32>
      %135 = arith.select %133, %134, %125 : vector<24x8xi1>, vector<24x8xf32>
      %c3_i32_77 = arith.constant 3 : i32
      %136 = vector.broadcast %c3_i32_77 : i32 to vector<24x8xi32>
      %137 = arith.cmpi eq, %1, %136 : vector<24x8xi32>
      %c3_i32_78 = arith.constant 3 : i32
      %138 = arith.addi %55, %c3_i32_78 : i32
      %139 = arith.index_cast %138 : i32 to index
      %140 = memref.load %arg1[%139] : memref<32xi32, #tpu.memory_space<smem>>
      %141 = vector.broadcast %140 : i32 to vector<24x8xi32>
      %142 = arith.cmpi eq, %0, %141 : vector<24x8xi32>
      %143 = arith.andi %137, %142 : vector<24x8xi1>
      %cst_79 = arith.constant 1.000000e+00 : f32
      %144 = vector.broadcast %cst_79 : f32 to vector<24x8xf32>
      %145 = arith.select %143, %144, %135 : vector<24x8xi1>, vector<24x8xf32>
      %c4_i32_80 = arith.constant 4 : i32
      %146 = vector.broadcast %c4_i32_80 : i32 to vector<24x8xi32>
      %147 = arith.cmpi eq, %1, %146 : vector<24x8xi32>
      %c4_i32_81 = arith.constant 4 : i32
      %148 = arith.addi %55, %c4_i32_81 : i32
      %149 = arith.index_cast %148 : i32 to index
      %150 = memref.load %arg1[%149] : memref<32xi32, #tpu.memory_space<smem>>
      %151 = vector.broadcast %150 : i32 to vector<24x8xi32>
      %152 = arith.cmpi eq, %0, %151 : vector<24x8xi32>
      %153 = arith.andi %147, %152 : vector<24x8xi1>
      %cst_82 = arith.constant 1.000000e+00 : f32
      %154 = vector.broadcast %cst_82 : f32 to vector<24x8xf32>
      %155 = arith.select %153, %154, %145 : vector<24x8xi1>, vector<24x8xf32>
      %c5_i32_83 = arith.constant 5 : i32
      %156 = vector.broadcast %c5_i32_83 : i32 to vector<24x8xi32>
      %157 = arith.cmpi eq, %1, %156 : vector<24x8xi32>
      %c5_i32_84 = arith.constant 5 : i32
      %158 = arith.addi %55, %c5_i32_84 : i32
      %159 = arith.index_cast %158 : i32 to index
      %160 = memref.load %arg1[%159] : memref<32xi32, #tpu.memory_space<smem>>
      %161 = vector.broadcast %160 : i32 to vector<24x8xi32>
      %162 = arith.cmpi eq, %0, %161 : vector<24x8xi32>
      %163 = arith.andi %157, %162 : vector<24x8xi1>
      %cst_85 = arith.constant 1.000000e+00 : f32
      %164 = vector.broadcast %cst_85 : f32 to vector<24x8xf32>
      %165 = arith.select %163, %164, %155 : vector<24x8xi1>, vector<24x8xf32>
      %c6_i32_86 = arith.constant 6 : i32
      %166 = vector.broadcast %c6_i32_86 : i32 to vector<24x8xi32>
      %167 = arith.cmpi eq, %1, %166 : vector<24x8xi32>
      %c6_i32_87 = arith.constant 6 : i32
      %168 = arith.addi %55, %c6_i32_87 : i32
      %169 = arith.index_cast %168 : i32 to index
      %170 = memref.load %arg1[%169] : memref<32xi32, #tpu.memory_space<smem>>
      %171 = vector.broadcast %170 : i32 to vector<24x8xi32>
      %172 = arith.cmpi eq, %0, %171 : vector<24x8xi32>
      %173 = arith.andi %167, %172 : vector<24x8xi1>
      %cst_88 = arith.constant 1.000000e+00 : f32
      %174 = vector.broadcast %cst_88 : f32 to vector<24x8xf32>
      %175 = arith.select %173, %174, %165 : vector<24x8xi1>, vector<24x8xf32>
      %c7_i32_89 = arith.constant 7 : i32
      %176 = vector.broadcast %c7_i32_89 : i32 to vector<24x8xi32>
      %177 = arith.cmpi eq, %1, %176 : vector<24x8xi32>
      %c7_i32_90 = arith.constant 7 : i32
      %178 = arith.addi %55, %c7_i32_90 : i32
      %179 = arith.index_cast %178 : i32 to index
      %180 = memref.load %arg1[%179] : memref<32xi32, #tpu.memory_space<smem>>
      %181 = vector.broadcast %180 : i32 to vector<24x8xi32>
      %182 = arith.cmpi eq, %0, %181 : vector<24x8xi32>
      %183 = arith.andi %177, %182 : vector<24x8xi1>
      %cst_91 = arith.constant 1.000000e+00 : f32
      %184 = vector.broadcast %cst_91 : f32 to vector<24x8xf32>
      %185 = arith.select %183, %184, %175 : vector<24x8xi1>, vector<24x8xf32>
      %c0_92 = arith.constant 0 : index
      %c0_93 = arith.constant 0 : index
      %186 = vector.load %arg11[%c0_92, %c0_93] : memref<24x128xf32, #tpu.memory_space<vmem>>, vector<24x128xf32>
      %cst_94 = arith.constant dense<0.000000e+00> : vector<24x128xf32>
      %187 = tpu.matmul %185, %104, %cst_94 {dimension_numbers = #tpu.dot_dimension_numbers<[1], [0], [0], [1], [0, 0, 1, 1], [], []>} : vector<24x8xf32>, vector<8x128xf32>, vector<24x128xf32> -> vector<24x128xf32>
      %188 = arith.addf %186, %187 : vector<24x128xf32>
      %c0_95 = arith.constant 0 : index
      %c0_96 = arith.constant 0 : index
      %189 = vector.load %arg11[%c0_95, %c0_96] : memref<24x128xf32, #tpu.memory_space<vmem>>, vector<24x128xf32>
      tpu.vector_store %arg11[%c0_95, %c0_96], %188 {strides = array<i32>} : memref<24x128xf32, #tpu.memory_space<vmem>>, vector<24x128xf32>,
    }
    %c4_i32_31 = arith.constant 4 : i32
    %c0_32 = arith.constant 0 : index
    %c0_33 = arith.constant 0 : index
    %34 = vector.load %arg11[%c0_32, %c0_33] : memref<24x128xf32, #tpu.memory_space<vmem>>, vector<24x128xf32>
    %c1_34 = arith.constant 1 : index
    %c0_35 = arith.constant 0 : index
    %c0_36 = arith.constant 0 : index
    %35 = vector.load %arg5[%c1_34, %c0_35, %c0_36] : memref<2x128x128xf32, #tpu.memory_space<vmem>>, vector<1x128x128xf32>
    %36 = vector.shape_cast %35 : vector<1x128x128xf32> to vector<128x128xf32>
    %cst_37 = arith.constant dense<0.000000e+00> : vector<24x128xf32>
    %37 = tpu.matmul %34, %36, %cst_37 {dimension_numbers = #tpu.dot_dimension_numbers<[1], [0], [0], [1], [0, 0, 1, 1], [], []>} : vector<24x128xf32>, vector<128x128xf32>, vector<24x128xf32> -> vector<24x128xf32>
    %c1_38 = arith.constant 1 : index
    %c0_39 = arith.constant 0 : index
    %c0_40 = arith.constant 0 : index
    %38 = vector.load %arg6[%c1_38, %c0_39, %c0_40] : memref<2x1x128xf32, #tpu.memory_space<vmem>>, vector<1x1x128xf32>
    %39 = vector.shape_cast %38 : vector<1x1x128xf32> to vector<1x128xf32>
    %40 = vector.broadcast %39 : vector<1x128xf32> to vector<24x128xf32>
    %41 = arith.addf %37, %40 : vector<24x128xf32>
    %cst_41 = arith.constant 0.000000e+00 : f32
    %42 = vector.broadcast %cst_41 : f32 to vector<24x128xf32>
    %43 = arith.maximumf %41, %42 : vector<24x128xf32>
    %c1_42 = arith.constant 1 : index
    %c0_43 = arith.constant 0 : index
    %c0_44 = arith.constant 0 : index
    %44 = vector.load %arg7[%c1_42, %c0_43, %c0_44] : memref<2x128x128xf32, #tpu.memory_space<vmem>>, vector<1x128x128xf32>
    %45 = vector.shape_cast %44 : vector<1x128x128xf32> to vector<128x128xf32>
    %cst_45 = arith.constant dense<0.000000e+00> : vector<24x128xf32>
    %46 = tpu.matmul %43, %45, %cst_45 {dimension_numbers = #tpu.dot_dimension_numbers<[1], [0], [0], [1], [0, 0, 1, 1], [], []>} : vector<24x128xf32>, vector<128x128xf32>, vector<24x128xf32> -> vector<24x128xf32>
    %c1_46 = arith.constant 1 : index
    %c0_47 = arith.constant 0 : index
    %c0_48 = arith.constant 0 : index
    %47 = vector.load %arg8[%c1_46, %c0_47, %c0_48] : memref<2x1x128xf32, #tpu.memory_space<vmem>>, vector<1x1x128xf32>
    %48 = vector.shape_cast %47 : vector<1x1x128xf32> to vector<1x128xf32>
    %49 = vector.broadcast %48 : vector<1x128xf32> to vector<24x128xf32>
    %50 = arith.addf %46, %49 : vector<24x128xf32>
    %c0_49 = arith.constant 0 : index
    %c0_50 = arith.constant 0 : index
    %51 = vector.load %arg9[%c0_49, %c0_50] : memref<24x128xf32, #tpu.memory_space<vmem>>, vector<24x128xf32>
    tpu.vector_store %arg9[%c0_49, %c0_50], %50 {strides = array<i32>} : memref<24x128xf32, #tpu.memory_space<vmem>>, vector<24x128xf32>,
    return
  }
}

</mosaic_0001>

<bundles_post_ra>
// kernel: gnn_node_forward.1
= control target key start
LH: loop header
LB: loop body
LE: loop exit
PB: predicated region body
PF: predicated region fallthrough
CT: control target
= control target key end

     0   :  { %14 = vsyncpa [#allocation5], 0  ;;  %s2412_s0 = inlined_call_operand.vmem [shape: s32[32], index: 0, kind: input, shape index: {}]   ;;  %s2413_s1 = inlined_call_operand.vmem [shape: s32[32], index: 1, kind: input, shape index: {}]   ;;  %s2414_s2 = inlined_call_operand.vmem [shape: f32[2], index: 2, kind: input, shape index: {}]   ;;  %s2415_s3 = inlined_call_operand.vmem [shape: f32[24,128], index: 3, kind: input, shape index: {}]   ;;  %s2416_s4 = inlined_call_operand.vmem [shape: f32[64,128], index: 4, kind: input, shape index: {}]   ;;  %s2417_s5 = inlined_call_operand.vmem [shape: f32[2,128,128], index: 5, kind: input, shape index: {}]   ;;  %s2418_s6 = inlined_call_operand.vmem [shape: f32[2,1,128], index: 6, kind: input, shape index: {}]   ;;  %s2419_s7 = inlined_call_operand.vmem [shape: f32[2,128,128], index: 7, kind: input, shape index: {}]   ;;  %s2420_s8 = inlined_call_operand.vmem [shape: f32[2,1,128], index: 8, kind: input, shape index: {}]   ;;  %s2421_s9 = inlined_call_operand.vmem [shape: f32[24,128], index: 9, kind: output, shape index: {}]  }
   0x1   :  { %15 = vsyncpa [#allocation7], 0  ;;  %s32_s11 = sshll.u32 %s2413_s1, 4  ;;  %s22_s14 = sshll.u32 %s2412_s0, 4  ;;  %s33_s11 = int_to_ptr.vmem [resolvable:$true] %s32_s11  ;;  %s23_s14 = int_to_ptr.vmem [resolvable:$true] %s22_s14 }
   0x2   :  { %s1560_s15 = scalar_lea.vmem %s33_s11, 16  ;;  %p1565_p1 = scmp.lt.s32.totalorder %s33_s11, %s33_s11 }
   0x3   :  { %p1561_p0 = scmp.ne.s32.totalorder %s33_s11, %s1560_s15  ;;  %p1566_p2 = scmp.lt.s32.totalorder %s1560_s15, %s1560_s15 }
   0x5   :  { %p1567_p3 = por %p1566_p2, %p1565_p1 }
   0x7   :  { %p1568_p4 = pnand %p1567_p3, %p1561_p0 }
   0x9   :  { %1571 = shalt.err (!%p1568_p4)
}
   0xa   :  { %s1616_s16 = smov [#allocation6]   ;;  %s1572_s17 = scalar_lea.vmem %s23_s14, 16 }
   0xb   :  { %35 = dma.vmem_to_smem %s33_s11, 16, %s1616_s16, [#allocation7]  }
   0xc   :  { %p1573_p5 = scmp.ne.s32.totalorder %s23_s14, %s1572_s17  ;;  %p1577_p6 = scmp.lt.s32.totalorder %s23_s14, %s23_s14 }
   0xd   :  { %p1578_p7 = scmp.lt.s32.totalorder %s1572_s17, %s1572_s17 }
   0xf   :  { %p1579_p8 = por %p1578_p7, %p1577_p6 }
  0x11   :  { %p1580_p9 = pnand %p1579_p8, %p1573_p5 }
  0x13   :  { %1583 = shalt.err (!%p1580_p9)
}
  0x14   :  { %s1617_s1 = smov [#allocation4]   ;;  %s42_s19 = sshll.u32 %s2414_s2, 4  ;;  %s43_s19 = int_to_ptr.vmem [resolvable:$true] %s42_s19 }
  0x15   :  { %25 = dma.vmem_to_smem %s23_s14, 16, %s1617_s1, [#allocation5]  }
  0x16   :  { %s1584_s20 = scalar_lea.vmem %s43_s19, 16  ;;  %p1589_p11 = scmp.lt.s32.totalorder %s43_s19, %s43_s19 }
  0x17   :  { %p1585_p10 = scmp.ne.s32.totalorder %s43_s19, %s1584_s20  ;;  %p1590_p12 = scmp.lt.s32.totalorder %s1584_s20, %s1584_s20 }
  0x19   :  { %p1591_p13 = por %p1590_p12, %p1589_p11 }
  0x1b   :  { %p1592_p0 = pnand %p1591_p13, %p1585_p10 }
  0x1d   :  { %1595 = shalt.err (!%p1592_p0)
}
  0x1e   :  { %s1618_s21 = smov [#allocation8]  }
  0x1f   :  { %45 = dma.vmem_to_smem %s43_s19, 16, %s1618_s21, [#allocation7]  }
  0x20   :  { %1604 = dma.done.wait [#allocation5], 16  }
  0x21   :  { %1605 = vsyncadd [#allocation5], 4294967280 }
  0x22   :  { %1606 = dma.done.wait [#allocation7], 32  }
  0x23   :  { %1607 = vsyncadd [#allocation7], 4294967264 }
  0x24   :  { %67 = sfence }
  0x25   :  { %v68_v0 = vlaneseq  ;;  %s74_s22 = sld [smem:[#allocation8]]  ;;  %v75_v5 = vld [vmem:[%s2415_s3] sm:$0xff]  ;;  %v76_v6 = vld [vmem:[%s2415_s3 + $0x8] sm:$0xff]  ;;  %v77_v7 = vld [vmem:[%s2415_s3 + $0x10] sm:$0xff]  ;;  %s1704_s28 = smov 0  }
  0x27   :  { %v1685_v1 = vshrl.u32 %v68_v0, 7  ;;  %v1687_v2 = vand.u32 127, %v68_v0 }
  0x29   :  { %v1690_v3 = vadd.s32 8, %v1685_v1  ;;  %v1693_v4 = vadd.s32 16, %v1685_v1 }
  0x2b   :  { %v78_v8 = vstv %s74_s22 }
  0x2c   :  { %v79_v9 = vmul.f32 %v78_v8, %v75_v5  ;;  %v80_v10 = vmul.f32 %v78_v8, %v76_v6  ;;  %v81_v11 = vmul.f32 %v78_v8, %v77_v7 }
  0x2e   :  { %82 = vst [vmem:[#allocation3] sm:$0xff] %v79_v9  ;;  %83 = vst [vmem:[#allocation3 + $0x8] sm:$0xff] %v80_v10 }
  0x2f   :  { %84 = vst [vmem:[#allocation3 + $0x10] sm:$0xff] %v81_v11 }
  0x30 LB: > { %v1619_v12 = vmov 0.0   ;;  %s1712_s29 = sshll.u32 %s1610_s28, 3  ;;  %vm2431_vm0 = vmmov 0   ;;  %vm2428_vm1 = vcmask 1040384   ;;  %vm2426_vm2 = vcmask 1041408   ;;  %s90_s28 = sadd.s32 1, %s1610_s28   ;;  %s1610_s28 = sphi %s1704_s28, %s90_s28  }
  0x31   : > { %1530 = vmatprep.subr.mxu1 %v1619_v12  ;;  %1248 = vmatprep.subr.mxu0 %v1619_v12  ;;  %s94_s12 = sld [smem:[#allocation4 + %s1712_s29]]  ;;  %s97_s13 = sadd.s32 1, %s1712_s29  ;;  %vm2425_vm3 = vcmask 1042432   ;;  %vm2423_vm4 = vcmask 1043456   ;;  %vm2424_vm5 = vcmask 1044480   ;;  %vm2427_vm6 = vcmask 1045504  }
  0x32   : > { %1253 = vmatprep.mubr.msk.f32.mxu1 %vm2431_vm0, %v1619_v12  ;;  %1250 = vmatprep.mubr.msk.f32.mxu0 %vm2431_vm0, %v1619_v12  ;;  %s101_s14 = sadd.s32 2, %s1712_s29  ;;  %s98_s15 = sld [smem:[#allocation4 + %s97_s13]]  ;;  %vm2430_vm7 = vcmask 1046528   ;;  %vm2429_vm8 = vcmp.eq.s32.totalorder %v1687_v2, 0  ;;  %vm2434_vm9 = vcmp.eq.s32.totalorder %v1687_v2, 1  ;;  %vm186_vm10 = vcmp.eq.s32.totalorder %v1687_v2, 2 }
  0x33   : > { %s102_s16 = sld [smem:[#allocation4 + %s101_s14]]  ;;  %s105_s17 = sadd.s32 3, %s1712_s29  ;;  %vm2432_vm11 = vcmp.eq.s32.totalorder %v1687_v2, 3  ;;  %vm210_vm12 = vcmp.eq.s32.totalorder %v1687_v2, 4  ;;  %vm222_vm13 = vcmp.eq.s32.totalorder %v1687_v2, 5  ;;  %vm2438_vm15 = vcmp.eq.s32.totalorder %v1687_v2, 6 }
  0x34   : > { %s2422_s1 = sadd.s32 4, %s1712_s29  ;;  %s106_s0 = sld [smem:[#allocation4 + %s105_s17]] }
  0x35   : > { %s110_s18 = sld [smem:[#allocation4 + %s2422_s1]]  ;;  %s113_s19 = sadd.s32 5, %s1712_s29  ;;  %v259_v11 = vld [vmem:[#allocation3 + $0x8] sm:$0xff] }
  0x36   : > { %s117_s20 = sadd.s32 6, %s1712_s29  ;;  %s1742_s23 = sld [smem:[#allocation4 + %s113_s19]] }
  0x37   : > { %s95_s2 = scalar_lea.vmem %s2415_s3, %s94_s12  ;;  %s1746_s24 = sld [smem:[#allocation4 + %s117_s20]] }
  0x38   : > { %s121_s25 = sadd.s32 7, %s1712_s29  ;;  %v96_v13 = vld [vmem:[%s95_s2] sm:$0x1]  ;;  %s99_s30 = scalar_lea.vmem %s2415_s3, %s98_s15 }
  0x39   : > { %s103_s1 = scalar_lea.vmem %s2415_s3, %s102_s16  ;;  %v100_v14 = vld [vmem:[%s99_s30] sm:$0x1]  ;;  %s1757_s12 = sld [smem:[#allocation4 + %s121_s25]] }
  0x3a   : > { %v104_v15 = vld [vmem:[%s103_s1] sm:$0x1]  ;;  %s1760_s21 = sld [smem:[#allocation6 + %s1712_s29]]  ;;  %s107_s11 = scalar_lea.vmem %s2415_s3, %s106_s0  ;;  %v126_v16 = vrot.slane %v100_v14, 7 }
  0x3b   : > { %s111_s26 = scalar_lea.vmem %s2415_s3, %s110_s18  ;;  %v129_v17 = vrot.slane %v104_v15, 6  ;;  %v108_v18 = vld [vmem:[%s107_s11] sm:$0x1]  ;;  %s1770_s1 = sld [smem:[#allocation6 + %s97_s13]]  ;;  %v258_v15 = vld [vmem:[#allocation3] sm:$0xff] }
  0x3c   : > { %v112_v19 = vld [vmem:[%s111_s26] sm:$0x1]  ;;  %s1774_s27 = sld [smem:[#allocation6 + %s101_s14]]  ;;  %s115_s10 = scalar_lea.vmem %s2415_s3, %s1742_s23  ;;  %v132_v20 = vrot.slane %v108_v18, 5  ;;  %v147_v22 = vsel %vm2428_vm1, %v96_v13, %v126_v16  ;;  %vm2433_vm1 = vcmp.eq.s32.totalorder %v1687_v2, 7 }
  0x3d   : > { %v135_v21 = vrot.slane %v112_v19, 4  ;;  %s1784_s18 = sld [smem:[#allocation6 + %s105_s17]]  ;;  %v116_v23 = vld [vmem:[%s115_s10] sm:$0x1]  ;;  %s119_s22 = scalar_lea.vmem %s2415_s3, %s1746_s24  ;;  %v149_v24 = vsel %vm2426_vm2, %v147_v22, %v129_v17  ;;  %v260_v19 = vld [vmem:[#allocation3 + $0x10] sm:$0xff] }
  0x3e   : > { %s2439_s23 = sadd.s32 4, %s1712_s29  ;;  %v120_v25 = vld [vmem:[%s119_s22] sm:$0x1]  ;;  %v138_v26 = vrot.slane %v116_v23, 3  ;;  %v151_v27 = vsel %vm2425_vm3, %v149_v24, %v132_v20  ;;  %s1802_s17 = sld [smem:[#allocation6 + %s113_s19]] }
  0x3f   : > { %s1796_s15 = sld [smem:[#allocation6 + %s2439_s23]]  ;;  %s123_s2 = scalar_lea.vmem %s2415_s3, %s1757_s12  ;;  %v141_v28 = vrot.slane %v120_v25, 2  ;;  %v153_v29 = vsel %vm2423_vm4, %v151_v27, %v135_v21 }
  0x40   : > { %s1806_s24 = sld [smem:[#allocation6 + %s117_s20]]  ;;  %v1814_v30 = vstv %s1760_s21  ;;  %v124_v31 = vld [vmem:[%s123_s2] sm:$0x1]  ;;  %v155_v32 = vsel %vm2424_vm5, %v153_v29, %v138_v26  ;;  %s2440_s21 = scalar_lea.vmem %s2416_s4, %s1712_s29 }
  0x41   : > { %s1819_s19 = sld [smem:[#allocation6 + %s121_s25]]  ;;  %vm166_vm14 = vcmp.eq.s32.totalorder %v1690_v3, %v1814_v30  ;;  %vm165_vm4 = vcmp.eq.s32.totalorder %v1685_v1, %v1814_v30  ;;  %v93_v33 = vld [vmem:[%s2440_s21] sm:$0xff]  ;;  %v144_v34 = vrot.slane %v124_v31, 1  ;;  %v157_v35 = vsel %vm2427_vm6, %v155_v32, %v141_v28  ;;  %p87_p1 = scmp.ge.s32.totalorder %s90_s28, 4  }
  0x42   : > { %vm169_vm5 = vmand %vm2429_vm8, %vm166_vm14  ;;  %v1836_v36 = vstv %s1770_s1  ;;  %v1839_v37 = vstv %s1774_s27  ;;  %v360_v23 = vld [vmem:[%s2417_s5] sm:$0xff] (%p87_p1)  ;;  %v361_v24 = vld [vmem:[%s2417_s5 + $0x8] sm:$0xff] (%p87_p1)  ;;  %v1621_v26 = vmov (%p87_p1), 0.0|0.0   ;;  %v1623_v29 = vmov (%p87_p1), 0.0   ;;  %s2090_s16 = smov (%p87_p1), 0  }
  0x43   : > { %v172_v38 = vsel %vm169_vm5, 1.0, %v1619_v12  ;;  %vm178_vm3 = vcmp.eq.s32.totalorder %v1690_v3, %v1836_v36  ;;  %vm190_vm2 = vcmp.eq.s32.totalorder %v1690_v3, %v1839_v37  ;;  %v1847_v39 = vstv %s1784_s18  ;;  %vm1851_vm14 = vmand %vm2429_vm8, %vm165_vm4  ;;  %v362_v25 = vld [vmem:[%s2417_s5 + $0x10] sm:$0xff] (%p87_p1)  ;;  %v363_v28 = vld [vmem:[%s2417_s5 + $0x18] sm:$0xff] (%p87_p1) }
  0x44   : > { %v159_v41 = vsel %vm2430_vm7, %v157_v35, %v144_v34  ;;  %vm181_vm5 = vmand %vm2434_vm9, %vm178_vm3  ;;  %vm202_vm6 = vcmp.eq.s32.totalorder %v1690_v3, %v1847_v39  ;;  %v1869_v45 = vstv %s1802_s17  ;;  %v171_v53 = vsel %vm1851_vm14, 1.0, %v1619_v12  ;;  %v364_v31 = vld [vmem:[%s2417_s5 + $0x20] sm:$0xff] (%p87_p1)  ;;  %v365_v32 = vld [vmem:[%s2417_s5 + $0x28] sm:$0xff] (%p87_p1)  ;;  %s1121_s17 = sld [smem:[#allocation8 + $0x1]] (%p87_p1) }
  0x45   : > { %v1861_v42 = vstv %s1796_s15  ;;  %v160_v43 = vadd.f32 %v159_v41, %v93_v33  ;;  %v184_v44 = vsel %vm181_vm5, 1.0, %v172_v38  ;;  %vm193_vm4 = vmand %vm186_vm10, %vm190_vm2  ;;  %vm226_vm7 = vcmp.eq.s32.totalorder %v1690_v3, %v1869_v45  ;;  %v466_v33 = vld [vmem:[%s2419_s7] sm:$0xff] (%p87_p1)  ;;  %v467_v34 = vld [vmem:[%s2419_s7 + $0x8] sm:$0xff] (%p87_p1) }
  0x46   : > { %vm214_vm8 = vcmp.eq.s32.totalorder %v1690_v3, %v1861_v42  ;;  %v196_v46 = vsel %vm193_vm4, 1.0, %v184_v44  ;;  %vm205_vm3 = vmand %vm2432_vm11, %vm202_vm6  ;;  %v236_v47 = vstv %s1806_s24  ;;  %vm177_vm4 = vcmp.eq.s32.totalorder %v1685_v1, %v1836_v36  ;;  %v469_v38 = vld [vmem:[%s2419_s7 + $0x18] sm:$0xff] (%p87_p1) }
  0x47   : > { %v1877_v48 = vstv %s1819_s19  ;;  %v161_v49 = vmax.f32 %v160_v43, 0.0  ;;  %v208_v50 = vsel %vm205_vm3, 1.0, %v196_v46  ;;  %vm217_vm2 = vmand %vm210_vm12, %vm214_vm8  ;;  %vm238_vm5 = vcmp.eq.s32.totalorder %v1690_v3, %v236_v47  ;;  %v367_v40 = vld [vmem:[%s2417_s5 + $0x38] sm:$0xff] (%p87_p1)  ;;  %v471_v43 = vld [vmem:[%s2419_s7 + $0x28] sm:$0xff] (%p87_p1) }
  0x48   : > { %vm250_vm0 = vcmp.eq.s32.totalorder %v1690_v3, %v1877_v48  ;;  %v220_v51 = vsel %vm217_vm2, 1.0, %v208_v50  ;;  %vm229_vm6 = vmand %vm222_vm13, %vm226_vm7  ;;  %vm2435_vm11 = vcmask 64512   ;;  %vm189_vm8 = vcmp.eq.s32.totalorder %v1685_v1, %v1839_v37  ;;  %v369_v46 = vld [vmem:[%s2417_s5 + $0x48] sm:$0xff] (%p87_p1) }
  0x49   : > { %1531 = vmatpush3.msra.mxu1 %v161_v49  ;;  %v232_v52 = vsel %vm229_vm6, 1.0, %v220_v51  ;;  %vm241_vm3 = vmand %vm2438_vm15, %vm238_vm5  ;;  %1249 = vmatpush3.msra.mxu0 %v161_v49  ;;  %vm201_vm2 = vcmp.eq.s32.totalorder %v1685_v1, %v1847_v39  ;;  %vm213_vm6 = vcmp.eq.s32.totalorder %v1685_v1, %v1861_v42  ;;  %v1435_v27 = vpack.c.bf16 (%p87_p1), %v361_v24, %v360_v23  ;;  %v473_v49 = vld [vmem:[%s2419_s7 + $0x38] sm:$0xff] (%p87_p1)  ;;  %v370_v51 = vld [vmem:[%s2417_s5 + $0x50] sm:$0xff] (%p87_p1) }
  0x4a   : > { %v244_v54 = vsel %vm241_vm3, 1.0, %v232_v52  ;;  %vm253_vm7 = vmand %vm2433_vm1, %vm250_vm0  ;;  %vm225_vm3 = vcmp.eq.s32.totalorder %v1685_v1, %v1869_v45  ;;  %vm2443_vm0 = vcmp.eq.s32.totalorder %v1687_v2, 3  ;;  %1434 = vmatprep.subr.bf16.mxu0 (%p87_p1), %v1621_v26  ;;  %1458 = vmatprep.subr.bf16.mxu1 (%p87_p1), %v1621_v26  ;;  %v1441_v35 = vpack.c.bf16 (%p87_p1), %v365_v32, %v364_v31  ;;  %v371_v52 = vld [vmem:[%s2417_s5 + $0x58] sm:$0xff] (%p87_p1)  ;;  %v1120_v31 = vld [vmem:[%s2420_s8] ss:$0 sm:$0xff] (%p87_p1) }
  0x4b   : > { %v256_v55 = vsel %vm253_vm7, 1.0, %v244_v54  ;;  %vm180_vm5 = vmand %vm2434_vm9, %vm177_vm4  ;;  %vm237_vm7 = vcmp.eq.s32.totalorder %v1685_v1, %v236_v47  ;;  %vm2444_vm4 = vmmov 0   ;;  %v474_v54 = vld [vmem:[%s2419_s7 + $0x40] sm:$0xff] (%p87_p1) }
  0x4c   : > { %1254 = vmatmul.mubr.msk.f32.vlgmr.msra.gmra.mrb[0].mxu1 %vm2435_vm11, %v256_v55  ;;  %v183_v56 = vsel %vm180_vm5, 1.0, %v171_v53  ;;  %vm192_vm14 = vmand %vm186_vm10, %vm189_vm8  ;;  %vm249_vm5 = vcmp.eq.s32.totalorder %v1685_v1, %v1877_v48  ;;  %v475_v55 = vld [vmem:[%s2419_s7 + $0x48] sm:$0xff] (%p87_p1) }
  0x4d   : > { %v195_v57 = vsel %vm192_vm14, 1.0, %v183_v56  ;;  %vm204_vm1 = vmand %vm2443_vm0, %vm201_vm2  ;;  %1256 = vmatprep.mubr.msk.f32.mxu1 %vm2444_vm4, %v1619_v12  ;;  %vm167_vm14 = vcmp.eq.s32.totalorder %v1693_v4, %v1814_v30  ;;  %v1438_v30 = vpack.c.bf16 (%p87_p1), %v363_v28, %v362_v25  ;;  %v1450_v56 = vpack.c.bf16 (%p87_p1), %v371_v52, %v370_v51 }
  0x4e   : > { %v207_v58 = vsel %vm204_vm1, 1.0, %v195_v57  ;;  %vm216_vm9 = vmand %vm210_vm12, %vm213_vm6  ;;  %vm179_vm1 = vcmp.eq.s32.totalorder %v1693_v4, %v1836_v36  ;;  %vm2445_vm6 = vcmp.eq.s32.totalorder %v1687_v2, 7  ;;  %v1459_v36 = vpack.c.bf16 (%p87_p1), %v467_v34, %v466_v33  ;;  %v372_v57 = vld [vmem:[%s2417_s5 + $0x60] sm:$0xff] (%p87_p1) }
  0x4f   : > { %v219_v59 = vsel %vm216_vm9, 1.0, %v207_v58  ;;  %vm228_vm8 = vmand %vm222_vm13, %vm225_vm3  ;;  %vm191_vm9 = vcmp.eq.s32.totalorder %v1693_v4, %v1839_v37  ;;  %vm2446_vm3 = vcmp.eq.s32.totalorder %v1687_v2, 0  ;;  %v468_v37 = vld [vmem:[%s2419_s7 + $0x10] sm:$0xff] (%p87_p1)  ;;  %v373_v58 = vld [vmem:[%s2417_s5 + $0x68] sm:$0xff] (%p87_p1) }
  0x50   : > { %v231_v60 = vsel %vm228_vm8, 1.0, %v219_v59  ;;  %vm240_vm2 = vmand %vm2438_vm15, %vm237_vm7  ;;  %vm203_vm8 = vcmp.eq.s32.totalorder %v1693_v4, %v1847_v39  ;;  %vm2447_vm7 = vcmp.eq.s32.totalorder %v1687_v2, 1  ;;  %v366_v39 = vld [vmem:[%s2417_s5 + $0x30] sm:$0xff] (%p87_p1)  ;;  %1460 = vmatpush3.bf16.msra.mxu1 (%p87_p1), %v1459_v36  ;;  %v1462_v41 = vpack.c.bf16 (%p87_p1), %v469_v38, %v468_v37 }
  0x51   : > { %v243_v61 = vsel %vm240_vm2, 1.0, %v231_v60  ;;  %vm252_vm0 = vmand %vm2445_vm6, %vm249_vm5  ;;  %vm215_vm5 = vcmp.eq.s32.totalorder %v1693_v4, %v1861_v42  ;;  %1461 = vmatprep.subr.bf16.mxu1 (%p87_p1), %v1621_v26  ;;  %v470_v42 = vld [vmem:[%s2419_s7 + $0x20] sm:$0xff] (%p87_p1)  ;;  %v1444_v44 = vpack.c.bf16 (%p87_p1), %v367_v40, %v366_v39  ;;  %v1471_v59 = vpack.c.bf16 (%p87_p1), %v475_v55, %v474_v54  ;;  %v476_v60 = vld [vmem:[%s2419_s7 + $0x50] sm:$0xff] (%p87_p1) }
  0x52   : > { %v255_v62 = vsel %vm252_vm0, 1.0, %v243_v61  ;;  %vm170_vm4 = vmand %vm2446_vm3, %vm167_vm14  ;;  %vm227_vm14 = vcmp.eq.s32.totalorder %v1693_v4, %v1869_v45  ;;  %vm2448_vm0 = vcmp.eq.s32.totalorder %v1687_v2, 3  ;;  %v368_v45 = vld [vmem:[%s2417_s5 + $0x40] sm:$0xff] (%p87_p1)  ;;  %v477_v61 = vld [vmem:[%s2419_s7 + $0x58] sm:$0xff] (%p87_p1) }
  0x53   : > { %1251 = vmatmul.mubr.msk.f32.vlgmr.msra.gmra.mrb[0].mxu0 %vm2435_vm11, %v255_v62  ;;  %v173_v63 = vsel %vm170_vm4, 1.0, %v1619_v12  ;;  %vm182_vm2 = vmand %vm2447_vm7, %vm179_vm1  ;;  %vm239_vm11 = vcmp.eq.s32.totalorder %v1693_v4, %v236_v47  ;;  %vm251_vm4 = vcmp.eq.s32.totalorder %v1693_v4, %v1877_v48  ;;  %v1465_v47 = vpack.c.bf16 (%p87_p1), %v471_v43, %v470_v42  ;;  %v472_v48 = vld [vmem:[%s2419_s7 + $0x30] sm:$0xff] (%p87_p1) }
  0x54   : > { %v185_v0 = vsel %vm182_vm2, 1.0, %v173_v63  ;;  %vm194_vm6 = vmand %vm186_vm10, %vm191_vm9  ;;  %1436 = vmatpush3.bf16.msra.mxu0 (%p87_p1), %v1435_v27  ;;  %1463 = vmatpush3.bf16.msra.mxu1 (%p87_p1), %v1462_v41  ;;  %v1447_v50 = vpack.c.bf16 (%p87_p1), %v369_v46, %v368_v45  ;;  %v1468_v53 = vpack.c.bf16 (%p87_p1), %v473_v49, %v472_v48  ;;  %v1453_v62 = vpack.c.bf16 (%p87_p1), %v373_v58, %v372_v57  ;;  %v374_v63 = vld [vmem:[%s2417_s5 + $0x70] sm:$0xff] (%p87_p1) }
  0x55   : > { %v197_v5 = vsel %vm194_vm6, 1.0, %v185_v0  ;;  %vm206_vm3 = vmand %vm2448_vm0, %vm203_vm8  ;;  %vm2449_vm8 = vcmp.eq.s32.totalorder %v1687_v2, 7  ;;  %vm2450_vm6 = vcmask 64512   ;;  %1437 = vmatprep.subr.bf16.mxu0 (%p87_p1), %v1621_v26  ;;  %1464 = vmatprep.subr.bf16.mxu1 (%p87_p1), %v1621_v26  ;;  %v375_v0 = vld [vmem:[%s2417_s5 + $0x78] sm:$0xff] (%p87_p1) }
  0x56   : > { %v209_v6 = vsel %vm206_vm3, 1.0, %v197_v5  ;;  %vm218_vm1 = vmand %vm210_vm12, %vm215_vm5  ;;  %v1474_v5 = vpack.c.bf16 (%p87_p1), %v477_v61, %v476_v60 }
  0x57   : > { %v221_v7 = vsel %vm218_vm1, 1.0, %v209_v6  ;;  %vm230_vm9 = vmand %vm222_vm13, %vm227_vm14  ;;  %v478_v6 = vld [vmem:[%s2419_s7 + $0x60] sm:$0xff] (%p87_p1) }
  0x58   : > { %v233_v8 = vsel %vm230_vm9, 1.0, %v221_v7  ;;  %vm242_vm7 = vmand %vm2438_vm15, %vm239_vm11  ;;  %vm2436_vm11 = vmmov (%p87_p1), 0   ;;  %1439 = vmatpush3.bf16.msra.mxu0 (%p87_p1), %v1438_v30  ;;  %1466 = vmatpush3.bf16.msra.mxu1 (%p87_p1), %v1465_v47  ;;  %v479_v7 = vld [vmem:[%s2419_s7 + $0x68] sm:$0xff] (%p87_p1) }
  0x59   : > { %v245_v9 = vsel %vm242_vm7, 1.0, %v233_v8  ;;  %vm254_vm2 = vmand %vm2449_vm8, %vm251_vm4  ;;  %1291 = vmatprep.mubr.msk.f32.mxu0 (%p87_p1), %vm2436_vm11, %v1623_v29  ;;  %1440 = vmatprep.subr.bf16.mxu0 (%p87_p1), %v1621_v26  ;;  %v1456_v8 = vpack.c.bf16 (%p87_p1), %v375_v0, %v374_v63 }
  0x5a   : > { %v257_v10 = vsel %vm254_vm2, 1.0, %v245_v9  ;;  %1467 = vmatprep.subr.bf16.mxu1 (%p87_p1), %v1621_v26  ;;  %v1477_v9 = vpack.c.bf16 (%p87_p1), %v479_v7, %v478_v6 }
  0x5b   : > { %1257 = vmatmul.mubr.msk.f32.gmra.mrb[2].mxu1 %vm2450_vm6, %v257_v10 }
  0x5c   :  { %1332 = vmatprep.mubr.msk.f32.mxu1 (%p87_p1), %vm2436_vm11, %v1623_v29  ;;  %1442 = vmatpush3.bf16.msra.mxu0 (%p87_p1), %v1441_v35  ;;  %v579_v35 = vstv (%p87_p1), %s1121_s17 }
  0x5d   :  { %1443 = vmatprep.subr.bf16.mxu0 (%p87_p1), %v1621_v26  ;;  %1469 = vmatpush3.bf16.msra.mxu1 (%p87_p1), %v1468_v53 }
  0x5e   :  { %1470 = vmatprep.subr.bf16.mxu1 (%p87_p1), %v1621_v26 }
  0x60   :  { %1445 = vmatpush3.bf16.msra.mxu0 (%p87_p1), %v1444_v44 }
  0x61   :  { %1446 = vmatprep.subr.bf16.mxu0 (%p87_p1), %v1621_v26  ;;  %1472 = vmatpush3.bf16.msra.mxu1 (%p87_p1), %v1471_v59 }
  0x62   :  { %1473 = vmatprep.subr.bf16.mxu1 (%p87_p1), %v1621_v26 }
  0x64   :  { %1448 = vmatpush3.bf16.msra.mxu0 (%p87_p1), %v1447_v50 }
  0x65   :  { %1449 = vmatprep.subr.bf16.mxu0 (%p87_p1), %v1621_v26  ;;  %1475 = vmatpush3.bf16.msra.mxu1 (%p87_p1), %v1474_v5 }
  0x66   :  { %1476 = vmatprep.subr.bf16.mxu1 (%p87_p1), %v1621_v26 }
  0x68   :  { %1451 = vmatpush3.bf16.msra.mxu0 (%p87_p1), %v1450_v56 }
  0x69   :  { %1452 = vmatprep.subr.bf16.mxu0 (%p87_p1), %v1621_v26  ;;  %1478 = vmatpush3.bf16.msra.mxu1 (%p87_p1), %v1477_v9 }
  0x6a   :  { %1479 = vmatprep.subr.bf16.mxu1 (%p87_p1), %v1621_v26 }
  0x6c   :  { %1454 = vmatpush3.bf16.msra.mxu0 (%p87_p1), %v1453_v62 }
  0x6d   :  { %1455 = vmatprep.subr.bf16.mxu0 (%p87_p1), %v1621_v26 }
  0x70   :  { %1457 = vmatpush3.bf16.msra.mxu0 (%p87_p1), %v1456_v8 }
 0x11f   : > { %v342_v12 = vpop.f32.mrb[0].mxu1 }
 0x120   : > { %v352_v13 = vadd.f32 %v342_v12, %v259_v11  ;;  %v1255_v14 = vpop.f32.mrb[1].mxu1 }
 0x121   :  { %v481_v14 = vld [vmem:[%s2419_s7 + $0x78] sm:$0xff] (%p87_p1) }
 0x122   : > { %355 = vst [vmem:[#allocation3 + $0x8] sm:$0xff] %v352_v13  ;;  %v480_v13 = vld [vmem:[%s2419_s7 + $0x70] sm:$0xff] (%p87_p1) }
 0x126   : > { %v337_v16 = vpop.f32.mrb[0].mxu0 }
 0x127   : > { %v351_v17 = vadd.f32 %v337_v16, %v258_v15  ;;  %v1252_v18 = vpop.f32.mrb[1].mxu0  ;;  %v1480_v15 = vpack.c.bf16 (%p87_p1), %v481_v14, %v480_v13  ;;  %v1119_v16 = vld [vmem:[%s2418_s6] ss:$0 sm:$0xff] (%p87_p1) }
 0x129   : > { %354 = vst [vmem:[#allocation3] sm:$0xff] %v351_v17  ;;  %v358_v11 = vld [vmem:[#allocation3 + $0x8] sm:$0xff] (%p87_p1)  ;;  %1481 = vmatpush3.bf16.msra.mxu1 (%p87_p1), %v1480_v15 }
 0x12b   :  { %89 = sbr.rel (!%p87_p1) target bundleno = 48 (0x30), region = 104 }
 0x12e   : > { %v347_v20 = vpop.f32.mrb[2].mxu1 }
 0x12f   : > { %v353_v21 = vadd.f32 %v347_v20, %v260_v19  ;;  %v1258_v22 = vpop.f32.mrb[3].mxu1 }
 0x130   :  { %v357_v10 = vld [vmem:[#allocation3] sm:$0xff] (%p87_p1) }
 0x131   : > { %356 = vst [vmem:[#allocation3 + $0x10] sm:$0xff] %v353_v21  ;;  %1292 = vmatmul.mubr.f32.vlgmr.msra.gmra.mrb[0].mxu0 (%p87_p1), %v357_v10 }
 0x132   :  { %1294 = vmatprep.mubr.msk.f32.mxu0 %vm2436_vm11, %v1623_v29 }
 0x135   :  { %1295 = vmatmul.mubr.f32.gmra.mrb[2].mxu0 %v358_v11 }
 0x136   :  { %1297 = vmatprep.mubr.msk.f32.mxu0 %vm2436_vm11, %v1623_v29 }
 0x138   :  { %v359_v12 = vld [vmem:[#allocation3 + $0x10] sm:$0xff] }
 0x139   :  { %1298 = vmatmul.mubr.f32.gmra.mrb[4].mxu0 %v359_v12 }
 0x204   :  { %v449_v17 = vpop.f32.mrb[0].mxu0 }
 0x205   :  { %v450_v18 = vadd.f32 %v1119_v16, %v449_v17  ;;  %v1293_v19 = vpop.f32.mrb[1].mxu0 }
 0x207   :  { %v463_v20 = vmax.f32 %v450_v18, 0.0 }
 0x208   :  { %v454_v21 = vpop.f32.mrb[2].mxu0 }
 0x209   :  { %v455_v22 = vadd.f32 %v1119_v16, %v454_v21  ;;  %v1296_v23 = vpop.f32.mrb[3].mxu0  ;;  %1333 = vmatmul.mubr.f32.vlgmr.msra.gmra.mrb[0].mxu1 %v463_v20 }
 0x20a   :  { %1335 = vmatprep.mubr.msk.f32.mxu1 %vm2436_vm11, %v1623_v29 }
 0x20b   :  { %v464_v24 = vmax.f32 %v455_v22, 0.0 }
 0x20c   :  { %v459_v25 = vpop.f32.mrb[4].mxu0 }
 0x20d   :  { %v460_v27 = vadd.f32 %v1119_v16, %v459_v25  ;;  %v1299_v28 = vpop.f32.mrb[5].mxu0  ;;  %1336 = vmatmul.mubr.f32.gmra.mrb[2].mxu1 %v464_v24 }
 0x20e   :  { %1338 = vmatprep.mubr.msk.f32.mxu1 %vm2436_vm11, %v1623_v29 }
 0x20f   :  { %v465_v30 = vmax.f32 %v460_v27, 0.0 }
 0x211   :  { %1339 = vmatmul.mubr.f32.gmra.mrb[4].mxu1 %v465_v30 }
 0x2dc   :  { %v555_v32 = vpop.f32.mrb[0].mxu1 }
 0x2dd   :  { %v556_v33 = vadd.f32 %v1120_v31, %v555_v32  ;;  %v1334_v34 = vpop.f32.mrb[1].mxu1 }
 0x2df   :  { %v569_v36 = vmax.f32 %v556_v33, 0.0 }
 0x2e0   :  { %v560_v37 = vpop.f32.mrb[2].mxu1 }
 0x2e1   :  { %572 = vst [vmem:[#allocation2] sm:$0xff] %v569_v36  ;;  %v580_v38 = vmul.f32 %v579_v35, %v569_v36  ;;  %v561_v39 = vadd.f32 %v1120_v31, %v560_v37  ;;  %v1337_v40 = vpop.f32.mrb[3].mxu1 }
 0x2e3   :  { %583 = vst [vmem:[#allocation3] sm:$0xff] %v580_v38  ;;  %v570_v41 = vmax.f32 %v561_v39, 0.0 }
 0x2e4   :  { %v565_v42 = vpop.f32.mrb[4].mxu1 }
 0x2e5   :  { %573 = vst [vmem:[#allocation2 + $0x8] sm:$0xff] %v570_v41  ;;  %v581_v43 = vmul.f32 %v579_v35, %v570_v41  ;;  %v566_v44 = vadd.f32 %v1120_v31, %v565_v42  ;;  %v1340_v45 = vpop.f32.mrb[5].mxu1 }
 0x2e7   :  { %584 = vst [vmem:[#allocation3 + $0x8] sm:$0xff] %v581_v43  ;;  %v571_v46 = vmax.f32 %v566_v44, 0.0 }
 0x2e9   :  { %574 = vst [vmem:[#allocation2 + $0x10] sm:$0xff] %v571_v46  ;;  %v582_v47 = vmul.f32 %v579_v35, %v571_v46 }
 0x2eb   :  { %585 = vst [vmem:[#allocation3 + $0x10] sm:$0xff] %v582_v47 }
 0x2ec LB: > { %v1624_v48 = vmov 0.0   ;;  %vm1625_vm5 = vmmov 0   ;;  %s2099_s2 = sshll.u32 %s1614_s16, 3  ;;  %vm2451_vm14 = vcmask 1040384   ;;  %vm2452_vm0 = vcmask 1041408   ;;  %s591_s16 = sadd.s32 1, %s1614_s16   ;;  %s1614_s16 = sphi %s2090_s16, %s591_s16  }
 0x2ed   : > { %1532 = vmatprep.subr.mxu1 %v1624_v48  ;;  %1346 = vmatprep.mubr.msk.f32.mxu1 %vm1625_vm5, %v1624_v48  ;;  %s1095_s12 = scalar_lea.vmem %s2416_s4, %s2099_s2  ;;  %s596_s21 = sld [smem:[#allocation4 + %s2099_s2]]  ;;  %vm2453_vm3 = vcmask 1042432   ;;  %vm2454_vm1 = vcmask 1043456   ;;  %vm2455_vm4 = vcmask 1044480   ;;  %vm2456_vm8 = vcmask 1045504  }
 0x2ee   : > { %1341 = vmatprep.subr.mxu0 %v1624_v48  ;;  %1343 = vmatprep.mubr.msk.f32.mxu0 %vm1625_vm5, %v1624_v48  ;;  %s599_s29 = sadd.s32 1, %s2099_s2  ;;  %s603_s25 = sadd.s32 2, %s2099_s2  ;;  %v1124_v9 = vld [vmem:[%s1095_s12 + $0x20] sm:$0xff]  ;;  %vm2457_vm2 = vcmp.eq.s32.totalorder %v1687_v2, 0  ;;  %vm2464_vm15 = vcmp.eq.s32.totalorder %v1687_v2, 6 }
 0x2ef   : > { %s600_s26 = sld [smem:[#allocation4 + %s599_s29]]  ;;  %s607_s27 = sadd.s32 3, %s2099_s2 }
 0x2f0   : > { %s604_s1 = sld [smem:[#allocation4 + %s603_s25]]  ;;  %s611_s30 = sadd.s32 4, %s2099_s2 }
 0x2f1   : > { %s608_s0 = sld [smem:[#allocation4 + %s607_s27]]  ;;  %s615_s3 = sadd.s32 5, %s2099_s2 }
 0x2f2   : > { %s612_s10 = sld [smem:[#allocation4 + %s611_s30]]  ;;  %s619_s28 = sadd.s32 6, %s2099_s2 }
 0x2f3   : > { %s616_s18 = sld [smem:[#allocation4 + %s615_s3]]  ;;  %s623_s14 = sadd.s32 7, %s2099_s2 }
 0x2f4   : > { %s620_s13 = sld [smem:[#allocation4 + %s619_s28]]  ;;  %s597_s22 = scalar_lea.vmem [#allocation2], %s596_s21 }
 0x2f5   : > { %v598_v49 = vld [vmem:[%s597_s22] sm:$0x1]  ;;  %s601_s23 = scalar_lea.vmem [#allocation2], %s600_s26  ;;  %s2124_s17 = sld [smem:[#allocation4 + %s623_s14]] }
 0x2f6   : > { %v602_v50 = vld [vmem:[%s601_s23] sm:$0x1]  ;;  %s605_s15 = scalar_lea.vmem [#allocation2], %s604_s1  ;;  %s665_s24 = sld [smem:[#allocation6 + %s2099_s2]] }
 0x2f7   : > { %v606_v51 = vld [vmem:[%s605_s15] sm:$0x1]  ;;  %v628_v52 = vrot.slane %v602_v50, 7  ;;  %s609_s11 = scalar_lea.vmem [#allocation2], %s608_s0  ;;  %s677_s20 = sld [smem:[#allocation6 + %s599_s29]] }
 0x2f8   : > { %v631_v53 = vrot.slane %v606_v51, 6  ;;  %v610_v54 = vld [vmem:[%s609_s11] sm:$0x1]  ;;  %s613_s19 = scalar_lea.vmem [#allocation2], %s612_s10  ;;  %s689_s21 = sld [smem:[#allocation6 + %s603_s25]] }
 0x2f9   : > { %v614_v55 = vld [vmem:[%s613_s19] sm:$0x1]  ;;  %v634_v56 = vrot.slane %v610_v54, 5  ;;  %v649_v58 = vsel %vm2451_vm14, %v598_v49, %v628_v52  ;;  %s701_s26 = sld [smem:[#allocation6 + %s607_s27]]  ;;  %s617_s1 = scalar_lea.vmem [#allocation2], %s616_s18 }
 0x2fa   : > { %v637_v57 = vrot.slane %v614_v55, 4  ;;  %v618_v59 = vld [vmem:[%s617_s1] sm:$0x1]  ;;  %v651_v60 = vsel %vm2452_vm0, %v649_v58, %v631_v53  ;;  %s713_s0 = sld [smem:[#allocation6 + %s611_s30]]  ;;  %s621_s10 = scalar_lea.vmem [#allocation2], %s620_s13  ;;  %v760_v53 = vld [vmem:[#allocation3] sm:$0xff] }
 0x2fb   : > { %v622_v61 = vld [vmem:[%s621_s10] sm:$0x1]  ;;  %v640_v62 = vrot.slane %v618_v59, 3  ;;  %v653_v63 = vsel %vm2453_vm3, %v651_v60, %v634_v56  ;;  %s725_s29 = sld [smem:[#allocation6 + %s615_s3]]  ;;  %s625_s30 = scalar_lea.vmem [#allocation2], %s2124_s17  ;;  %vm2458_vm3 = vmmov %vm2457_vm2 }
 0x2fc   : > { %s2136_s25 = sld [smem:[#allocation6 + %s619_s28]]  ;;  %v643_v0 = vrot.slane %v622_v61, 2  ;;  %v655_v5 = vsel %vm2454_vm1, %v653_v63, %v637_v57  ;;  %v2139_v6 = vstv %s665_s24  ;;  %v626_v7 = vld [vmem:[%s625_s30] sm:$0x1]  ;;  %v762_v57 = vld [vmem:[#allocation3 + $0x10] sm:$0xff]  ;;  %p588_p2 = scmp.ge.s32.totalorder %s591_s16, 4  }
 0x2fd   : > { %s2143_s27 = sld [smem:[#allocation6 + %s623_s14]]  ;;  %v657_v8 = vsel %vm2455_vm4, %v655_v5, %v640_v62  ;;  %vm668_vm9 = vcmp.eq.s32.totalorder %v1690_v3, %v2139_v6  ;;  %vm667_vm7 = vcmp.eq.s32.totalorder %v1685_v1, %v2139_v6  ;;  %v646_v10 = vrot.slane %v626_v7, 1  ;;  %v761_v49 = vld [vmem:[#allocation3 + $0x8] sm:$0xff]  ;;  %v1129_v62 = vld [vmem:[%s2417_s5 + $0x88] sm:$0xff] (%p588_p2)  ;;  %v1130_v63 = vld [vmem:[%s2417_s5 + $0x90] sm:$0xff] (%p588_p2) }
 0x2fe   : > { %v659_v11 = vsel %vm2456_vm8, %v657_v8, %v643_v0  ;;  %vm671_vm6 = vmand %vm2457_vm2, %vm668_vm9  ;;  %v2159_v12 = vstv %s677_s20  ;;  %v2161_v13 = vstv %s689_s21  ;;  %vm2461_vm4 = vcmask 1046528   ;;  %v1128_v61 = vld [vmem:[%s2417_s5 + $0x80] sm:$0xff] (%p588_p2) }
 0x2ff   : > { %v674_v14 = vsel %vm671_vm6, 1.0, %v1624_v48  ;;  %vm680_vm14 = vcmp.eq.s32.totalorder %v1690_v3, %v2159_v12  ;;  %vm692_vm0 = vcmp.eq.s32.totalorder %v1690_v3, %v2161_v13  ;;  %v2168_v15 = vstv %s701_s26  ;;  %vm2172_vm1 = vmand %vm2458_vm3, %vm667_vm7  ;;  %v1146_v5 = vld [vmem:[%s2419_s7 + $0x80] sm:$0xff] (%p588_p2) }
 0x300   : > { %v661_v17 = vsel %vm2461_vm4, %v659_v11, %v646_v10  ;;  %vm2462_vm9 = vcmp.eq.s32.totalorder %v1687_v2, 1  ;;  %vm704_vm2 = vcmp.eq.s32.totalorder %v1690_v3, %v2168_v15  ;;  %v2181_v18 = vstv %s713_s0  ;;  %vm695_vm6 = vmand %vm186_vm10, %vm692_vm0  ;;  %v1149_v10 = vld [vmem:[%s2419_s7 + $0x98] sm:$0xff] (%p588_p2)  ;;  %v1134_v11 = vld [vmem:[%s2417_s5 + $0xb0] sm:$0xff] (%p588_p2) }
 0x301   : > { %vm683_vm8 = vmand %vm2462_vm9, %vm680_vm14  ;;  %v662_v19 = vadd.f32 %v1124_v9, %v661_v17  ;;  %vm716_vm7 = vcmp.eq.s32.totalorder %v1690_v3, %v2181_v18  ;;  %v2187_v21 = vstv %s725_s29  ;;  %vm2463_vm3 = vcmp.eq.s32.totalorder %v1687_v2, 3  ;;  %v1148_v9 = vld [vmem:[%s2419_s7 + $0x90] sm:$0xff] (%p588_p2)  ;;  %v1136_v17 = vld [vmem:[%s2417_s5 + $0xc0] sm:$0xff] (%p588_p2) }
 0x302   : > { %v686_v20 = vsel %vm683_vm8, 1.0, %v674_v14  ;;  %vm707_vm4 = vmand %vm2463_vm3, %vm704_vm2  ;;  %vm728_vm14 = vcmp.eq.s32.totalorder %v1690_v3, %v2187_v21  ;;  %v738_v23 = vstv %s2136_s25  ;;  %vm679_vm2 = vcmp.eq.s32.totalorder %v1685_v1, %v2159_v12  ;;  %v1150_v14 = vld [vmem:[%s2419_s7 + $0xa0] sm:$0xff] (%p588_p2) }
 0x303   : > { %v698_v22 = vsel %vm695_vm6, 1.0, %v686_v20  ;;  %v750_v24 = vstv %s2143_s27  ;;  %v663_v25 = vmax.f32 %v662_v19, 0.0  ;;  %vm719_vm9 = vmand %vm210_vm12, %vm716_vm7  ;;  %vm740_vm0 = vcmp.eq.s32.totalorder %v1690_v3, %v738_v23  ;;  %v1152_v20 = vld [vmem:[%s2419_s7 + $0xb0] sm:$0xff] (%p588_p2) }
 0x304   : > { %v710_v27 = vsel %vm707_vm4, 1.0, %v698_v22  ;;  %vm752_vm8 = vcmp.eq.s32.totalorder %v1690_v3, %v750_v24  ;;  %vm731_vm6 = vmand %vm222_vm13, %vm728_vm14  ;;  %v673_v31 = vsel %vm2172_vm1, 1.0, %v1624_v48  ;;  %vm691_vm7 = vcmp.eq.s32.totalorder %v1685_v1, %v2161_v13  ;;  %v1132_v3 = vld [vmem:[%s2417_s5 + $0xa0] sm:$0xff] (%p588_p2) }
 0x305   : > { %v722_v28 = vsel %vm719_vm9, 1.0, %v710_v27  ;;  %1533 = vmatpush3.msra.mxu1 %v663_v25  ;;  %vm743_vm3 = vmand %vm2464_vm15, %vm740_vm0  ;;  %1342 = vmatpush3.msra.mxu0 %v663_v25  ;;  %vm2465_vm4 = vcmp.eq.s32.totalorder %v1687_v2, 7  ;;  %vm703_vm9 = vcmp.eq.s32.totalorder %v1685_v1, %v2168_v15  ;;  %vm715_vm0 = vcmp.eq.s32.totalorder %v1685_v1, %v2181_v18  ;;  %v1154_v27 = vld [vmem:[%s2419_s7 + $0xc0] sm:$0xff] (%p588_p2) }
 0x306   : > { %v734_v30 = vsel %vm731_vm6, 1.0, %v722_v28  ;;  %vm755_vm14 = vmand %vm2465_vm4, %vm752_vm8  ;;  %vm2466_vm6 = vcmp.eq.s32.totalorder %v1687_v2, 1  ;;  %vm2467_vm15 = vcmask 64512   ;;  %vm2468_vm8 = vcmp.eq.s32.totalorder %v1687_v2, 3  ;;  %1482 = vmatprep.subr.bf16.mxu0 (%p588_p2), %v1621_v26  ;;  %1506 = vmatprep.subr.bf16.mxu1 (%p588_p2), %v1621_v26  ;;  %v1155_v28 = vld [vmem:[%s2419_s7 + $0xc8] sm:$0xff] (%p588_p2) }
 0x307   : > { %v746_v32 = vsel %vm743_vm3, 1.0, %v734_v30  ;;  %vm682_vm11 = vmand %vm2466_vm6, %vm679_vm2  ;;  %vm727_vm3 = vcmp.eq.s32.totalorder %v1685_v1, %v2187_v21  ;;  %v1483_v0 = vpack.c.bf16 (%p588_p2), %v1129_v62, %v1128_v61  ;;  %v1163_v62 = vld [vmem:[%s2420_s8 + $0x1] ss:$0 sm:$0xff] (%p588_p2) }
 0x308   : > { %v758_v33 = vsel %vm755_vm14, 1.0, %v746_v32  ;;  %v685_v34 = vsel %vm682_vm11, 1.0, %v673_v31  ;;  %vm694_vm1 = vmand %vm186_vm10, %vm691_vm7  ;;  %vm739_vm14 = vcmp.eq.s32.totalorder %v1685_v1, %v738_v23  ;;  %vm751_vm11 = vcmp.eq.s32.totalorder %v1685_v1, %v750_v24  ;;  %v1131_v1 = vld [vmem:[%s2417_s5 + $0x98] sm:$0xff] (%p588_p2)  ;;  %v1140_v31 = vld [vmem:[%s2417_s5 + $0xe0] sm:$0xff] (%p588_p2) }
 0x309   : > { %1347 = vmatmul.mubr.msk.f32.vlgmr.msra.gmra.mrb[0].mxu1 %vm2467_vm15, %v758_v33  ;;  %v697_v35 = vsel %vm694_vm1, 1.0, %v685_v34  ;;  %vm706_vm4 = vmand %vm2468_vm8, %vm703_vm9  ;;  %vm669_vm7 = vcmp.eq.s32.totalorder %v1693_v4, %v2139_v6  ;;  %vm2469_vm9 = vcmp.eq.s32.totalorder %v1687_v2, 6  ;;  %vm2470_vm1 = vcmp.eq.s32.totalorder %v1687_v2, 7  ;;  %v1147_v6 = vld [vmem:[%s2419_s7 + $0x88] sm:$0xff] (%p588_p2)  ;;  %v1156_v34 = vld [vmem:[%s2419_s7 + $0xd0] sm:$0xff] (%p588_p2) }
 0x30a   : > { %1349 = vmatprep.mubr.msk.f32.mxu1 %vm1625_vm5, %v1624_v48  ;;  %v709_v36 = vsel %vm706_vm4, 1.0, %v697_v35  ;;  %vm718_vm15 = vmand %vm210_vm12, %vm715_vm0  ;;  %vm681_vm5 = vcmp.eq.s32.totalorder %v1693_v4, %v2159_v12  ;;  %vm693_vm8 = vcmp.eq.s32.totalorder %v1693_v4, %v2161_v13  ;;  %v1507_v8 = vpack.c.bf16 (%p588_p2), %v1147_v6, %v1146_v5  ;;  %v1135_v12 = vld [vmem:[%s2417_s5 + $0xb8] sm:$0xff] (%p588_p2)  ;;  %v1141_v32 = vld [vmem:[%s2417_s5 + $0xe8] sm:$0xff] (%p588_p2) }
 0x30b   : > { %v721_v37 = vsel %vm718_vm15, 1.0, %v709_v36  ;;  %vm730_vm2 = vmand %vm222_vm13, %vm727_vm3  ;;  %vm2471_vm3 = vcmp.eq.s32.totalorder %v1687_v2, 0  ;;  %vm705_vm15 = vcmp.eq.s32.totalorder %v1693_v4, %v2168_v15  ;;  %v1510_v13 = vpack.c.bf16 (%p588_p2), %v1149_v10, %v1148_v9  ;;  %v1151_v15 = vld [vmem:[%s2419_s7 + $0xa8] sm:$0xff] (%p588_p2)  ;;  %v1157_v35 = vld [vmem:[%s2419_s7 + $0xd8] sm:$0xff] (%p588_p2) }
 0x30c   : > { %v733_v38 = vsel %vm730_vm2, 1.0, %v721_v37  ;;  %vm742_vm6 = vmand %vm2469_vm9, %vm739_vm14  ;;  %vm2472_vm2 = vcmask 64512   ;;  %vm2473_vm14 = vcmp.eq.s32.totalorder %v1687_v2, 1  ;;  %1508 = vmatpush3.bf16.msra.mxu1 (%p588_p2), %v1507_v8  ;;  %v1492_v16 = vpack.c.bf16 (%p588_p2), %v1135_v12, %v1134_v11  ;;  %v1142_v37 = vld [vmem:[%s2417_s5 + $0xf0] sm:$0xff] (%p588_p2) }
 0x30d   : > { %v745_v39 = vsel %vm742_vm6, 1.0, %v733_v38  ;;  %vm754_vm0 = vmand %vm2470_vm1, %vm751_vm11  ;;  %vm717_vm11 = vcmp.eq.s32.totalorder %v1693_v4, %v2181_v18  ;;  %vm2474_vm1 = vcmp.eq.s32.totalorder %v1687_v2, 3  ;;  %1509 = vmatprep.subr.bf16.mxu1 (%p588_p2), %v1621_v26  ;;  %v1137_v18 = vld [vmem:[%s2417_s5 + $0xc8] sm:$0xff] (%p588_p2)  ;;  %v1513_v19 = vpack.c.bf16 (%p588_p2), %v1151_v15, %v1150_v14  ;;  %v1143_v38 = vld [vmem:[%s2417_s5 + $0xf8] sm:$0xff] (%p588_p2) }
 0x30e   : > { %v757_v40 = vsel %vm754_vm0, 1.0, %v745_v39  ;;  %vm672_vm4 = vmand %vm2471_vm3, %vm669_vm7  ;;  %vm729_vm7 = vcmp.eq.s32.totalorder %v1693_v4, %v2187_v21  ;;  %vm741_vm3 = vcmp.eq.s32.totalorder %v1693_v4, %v738_v23  ;;  %v1153_v21 = vld [vmem:[%s2419_s7 + $0xb8] sm:$0xff] (%p588_p2)  ;;  %v1495_v22 = vpack.c.bf16 (%p588_p2), %v1137_v18, %v1136_v17  ;;  %v1138_v23 = vld [vmem:[%s2417_s5 + $0xd0] sm:$0xff] (%p588_p2) }
 0x30f   : > { %1344 = vmatmul.mubr.msk.f32.vlgmr.msra.gmra.mrb[0].mxu0 %vm2472_vm2, %v757_v40  ;;  %v675_v41 = vsel %vm672_vm4, 1.0, %v1624_v48  ;;  %vm684_vm9 = vmand %vm2473_vm14, %vm681_vm5  ;;  %vm753_vm4 = vcmp.eq.s32.totalorder %v1693_v4, %v750_v24  ;;  %v1133_v4 = vld [vmem:[%s2417_s5 + $0xa8] sm:$0xff] (%p588_p2)  ;;  %v1139_v24 = vld [vmem:[%s2417_s5 + $0xd8] sm:$0xff] (%p588_p2)  ;;  %v1516_v25 = vpack.c.bf16 (%p588_p2), %v1153_v21, %v1152_v20  ;;  %v1519_v33 = vpack.c.bf16 (%p588_p2), %v1155_v28, %v1154_v27 }
 0x310   : > { %v687_v42 = vsel %vm684_vm9, 1.0, %v675_v41  ;;  %vm696_vm6 = vmand %vm186_vm10, %vm693_vm8  ;;  %vm2475_vm8 = vcmp.eq.s32.totalorder %v1687_v2, 6  ;;  %vm2476_vm9 = vcmp.eq.s32.totalorder %v1687_v2, 7  ;;  %1484 = vmatpush3.bf16.msra.mxu0 (%p588_p2), %v1483_v0  ;;  %v1486_v2 = vpack.c.bf16 (%p588_p2), %v1131_v1, %v1130_v63  ;;  %1511 = vmatpush3.bf16.msra.mxu1 (%p588_p2), %v1510_v13  ;;  %v1158_v40 = vld [vmem:[%s2419_s7 + $0xe0] sm:$0xff] (%p588_p2)  ;;  %v1159_v41 = vld [vmem:[%s2419_s7 + $0xe8] sm:$0xff] (%p588_p2) }
 0x311   : > { %v699_v43 = vsel %vm696_vm6, 1.0, %v687_v42  ;;  %vm708_vm0 = vmand %vm2474_vm1, %vm705_vm15  ;;  %vm2477_vm6 = vcmask 64512   ;;  %1485 = vmatprep.subr.bf16.mxu0 (%p588_p2), %v1621_v26  ;;  %v1489_v7 = vpack.c.bf16 (%p588_p2), %v1133_v4, %v1132_v3  ;;  %1512 = vmatprep.subr.bf16.mxu1 (%p588_p2), %v1621_v26  ;;  %v1498_v30 = vpack.c.bf16 (%p588_p2), %v1139_v24, %v1138_v23 }
 0x312   : > { %v711_v44 = vsel %vm708_vm0, 1.0, %v699_v43  ;;  %vm720_vm5 = vmand %vm210_vm12, %vm717_vm11  ;;  %vm2478_vm11 = vmmov (%p588_p2), 0   ;;  %v1501_v36 = vpack.c.bf16 (%p588_p2), %v1141_v32, %v1140_v31  ;;  %v1522_v39 = vpack.c.bf16 (%p588_p2), %v1157_v35, %v1156_v34 }
 0x313   : > { %v723_v45 = vsel %vm720_vm5, 1.0, %v711_v44  ;;  %vm732_vm2 = vmand %vm222_vm13, %vm729_vm7  ;;  %1384 = vmatprep.mubr.msk.f32.mxu0 (%p588_p2), %vm2478_vm11, %v1623_v29  ;;  %v1504_v42 = vpack.c.bf16 (%p588_p2), %v1143_v38, %v1142_v37  ;;  %v1525_v43 = vpack.c.bf16 (%p588_p2), %v1159_v41, %v1158_v40 }
 0x314   : > { %v735_v46 = vsel %vm732_vm2, 1.0, %v723_v45  ;;  %vm744_vm14 = vmand %vm2475_vm8, %vm741_vm3  ;;  %1487 = vmatpush3.bf16.msra.mxu0 (%p588_p2), %v1486_v2  ;;  %1514 = vmatpush3.bf16.msra.mxu1 (%p588_p2), %v1513_v19 }
 0x315   : > { %v747_v47 = vsel %vm744_vm14, 1.0, %v735_v46  ;;  %vm756_vm15 = vmand %vm2476_vm9, %vm753_vm4  ;;  %1488 = vmatprep.subr.bf16.mxu0 (%p588_p2), %v1621_v26  ;;  %1515 = vmatprep.subr.bf16.mxu1 (%p588_p2), %v1621_v26 }
 0x316   : > { %v759_v48 = vsel %vm756_vm15, 1.0, %v747_v47  ;;  %v1160_v47 = vld [vmem:[%s2419_s7 + $0xf0] sm:$0xff] (%p588_p2) }
 0x317   : > { %1350 = vmatmul.mubr.msk.f32.gmra.mrb[2].mxu1 %vm2477_vm6, %v759_v48  ;;  %v1161_v48 = vld [vmem:[%s2419_s7 + $0xf8] sm:$0xff] (%p588_p2) }
 0x318   :  { %1425 = vmatprep.mubr.msk.f32.mxu1 (%p588_p2), %vm2478_vm11, %v1623_v29  ;;  %1490 = vmatpush3.bf16.msra.mxu0 (%p588_p2), %v1489_v7 }
 0x319   :  { %1491 = vmatprep.subr.bf16.mxu0 (%p588_p2), %v1621_v26  ;;  %1517 = vmatpush3.bf16.msra.mxu1 (%p588_p2), %v1516_v25 }
 0x31a   :  { %1518 = vmatprep.subr.bf16.mxu1 (%p588_p2), %v1621_v26 }
 0x31c   :  { %1493 = vmatpush3.bf16.msra.mxu0 (%p588_p2), %v1492_v16 }
 0x31d   :  { %1494 = vmatprep.subr.bf16.mxu0 (%p588_p2), %v1621_v26  ;;  %1520 = vmatpush3.bf16.msra.mxu1 (%p588_p2), %v1519_v33 }
 0x31e   :  { %1521 = vmatprep.subr.bf16.mxu1 (%p588_p2), %v1621_v26 }
 0x320   :  { %1496 = vmatpush3.bf16.msra.mxu0 (%p588_p2), %v1495_v22 }
 0x321   :  { %1497 = vmatprep.subr.bf16.mxu0 (%p588_p2), %v1621_v26  ;;  %1523 = vmatpush3.bf16.msra.mxu1 (%p588_p2), %v1522_v39 }
 0x322   :  { %1524 = vmatprep.subr.bf16.mxu1 (%p588_p2), %v1621_v26 }
 0x324   :  { %1499 = vmatpush3.bf16.msra.mxu0 (%p588_p2), %v1498_v30 }
 0x325   :  { %1500 = vmatprep.subr.bf16.mxu0 (%p588_p2), %v1621_v26  ;;  %1526 = vmatpush3.bf16.msra.mxu1 (%p588_p2), %v1525_v43 }
 0x326   :  { %1527 = vmatprep.subr.bf16.mxu1 (%p588_p2), %v1621_v26 }
 0x328   :  { %1502 = vmatpush3.bf16.msra.mxu0 (%p588_p2), %v1501_v36 }
 0x329   :  { %1503 = vmatprep.subr.bf16.mxu0 (%p588_p2), %v1621_v26  ;;  %v1145_v26 = vld [vmem:[%s2418_s6 + $0x1] ss:$0 sm:$0xff] (%p588_p2) }
 0x32c   :  { %1505 = vmatpush3.bf16.msra.mxu0 (%p588_p2), %v1504_v42 }
 0x3dc   : > { %v844_v50 = vpop.f32.mrb[0].mxu1 }
 0x3dd   : > { %v854_v51 = vadd.f32 %v844_v50, %v761_v49  ;;  %v1348_v52 = vpop.f32.mrb[1].mxu1  ;;  %v1528_v49 = vpack.c.bf16 (%p588_p2), %v1161_v48, %v1160_v47 }
 0x3df   : > { %857 = vst [vmem:[#allocation3 + $0x8] sm:$0xff] %v854_v51  ;;  %1529 = vmatpush3.bf16.msra.mxu1 (%p588_p2), %v1528_v49 }
 0x3e2   : > { %v839_v54 = vpop.f32.mrb[0].mxu0 }
 0x3e3   : > { %v853_v55 = vadd.f32 %v839_v54, %v760_v53  ;;  %v1345_v56 = vpop.f32.mrb[1].mxu0 }
 0x3e5   : > { %856 = vst [vmem:[#allocation3] sm:$0xff] %v853_v55 }
 0x3e6   :  { %v860_v45 = vld [vmem:[#allocation3 + $0x8] sm:$0xff] (%p588_p2) }
 0x3e7   :  { %590 = sbr.rel (!%p588_p2) target bundleno = 748 (0x2ec), region = 115 }
 0x3ea   : > { %v849_v58 = vpop.f32.mrb[2].mxu1 }
 0x3eb   : > { %v855_v59 = vadd.f32 %v849_v58, %v762_v57  ;;  %v1351_v60 = vpop.f32.mrb[3].mxu1 }
 0x3ec   :  { %v859_v44 = vld [vmem:[#allocation3] sm:$0xff] (%p588_p2) }
 0x3ed   : > { %858 = vst [vmem:[#allocation3 + $0x10] sm:$0xff] %v855_v59  ;;  %1385 = vmatmul.mubr.f32.vlgmr.msra.gmra.mrb[0].mxu0 (%p588_p2), %v859_v44 }
 0x3ee   :  { %1387 = vmatprep.mubr.msk.f32.mxu0 %vm2478_vm11, %v1623_v29 }
 0x3f1   :  { %1388 = vmatmul.mubr.f32.gmra.mrb[2].mxu0 %v860_v45 }
 0x3f2   :  { %1390 = vmatprep.mubr.msk.f32.mxu0 %vm2478_vm11, %v1623_v29 }
 0x3f4   :  { %v861_v46 = vld [vmem:[#allocation3 + $0x10] sm:$0xff] }
 0x3f5   :  { %1391 = vmatmul.mubr.f32.gmra.mrb[4].mxu0 %v861_v46 }
 0x4c0   :  { %v953_v50 = vpop.f32.mrb[0].mxu0 }
 0x4c1   :  { %v954_v51 = vadd.f32 %v1145_v26, %v953_v50  ;;  %v1386_v52 = vpop.f32.mrb[1].mxu0 }
 0x4c3   :  { %v967_v53 = vmax.f32 %v954_v51, 0.0 }
 0x4c4   :  { %v958_v54 = vpop.f32.mrb[2].mxu0 }
 0x4c5   :  { %v959_v55 = vadd.f32 %v1145_v26, %v958_v54  ;;  %v1389_v56 = vpop.f32.mrb[3].mxu0  ;;  %1426 = vmatmul.mubr.f32.vlgmr.msra.gmra.mrb[0].mxu1 %v967_v53 }
 0x4c6   :  { %1428 = vmatprep.mubr.msk.f32.mxu1 %vm2478_vm11, %v1623_v29 }
 0x4c7   :  { %v968_v57 = vmax.f32 %v959_v55, 0.0 }
 0x4c8   :  { %v963_v58 = vpop.f32.mrb[4].mxu0 }
 0x4c9   :  { %v964_v59 = vadd.f32 %v1145_v26, %v963_v58  ;;  %v1392_v60 = vpop.f32.mrb[5].mxu0  ;;  %1429 = vmatmul.mubr.f32.gmra.mrb[2].mxu1 %v968_v57 }
 0x4ca   :  { %1431 = vmatprep.mubr.msk.f32.mxu1 %vm2478_vm11, %v1623_v29 }
 0x4cb   :  { %v969_v61 = vmax.f32 %v964_v59, 0.0 }
 0x4cd   :  { %1432 = vmatmul.mubr.f32.gmra.mrb[4].mxu1 %v969_v61 }
 0x598   :  { %v1061_v63 = vpop.f32.mrb[0].mxu1 }
 0x599   :  { %v1062_v0 = vadd.f32 %v1163_v62, %v1061_v63  ;;  %v1427_v1 = vpop.f32.mrb[1].mxu1 }
 0x59b   :  { %1075 = vst [vmem:[%s2421_s9] sm:$0xff] %v1062_v0 }
 0x59c   :  { %v1066_v2 = vpop.f32.mrb[2].mxu1 }
 0x59d   :  { %v1067_v3 = vadd.f32 %v1163_v62, %v1066_v2  ;;  %v1430_v4 = vpop.f32.mrb[3].mxu1 }
 0x59f   :  { %1076 = vst [vmem:[%s2421_s9 + $0x8] sm:$0xff] %v1067_v3 }
 0x5a0   :  { %v1071_v29 = vpop.f32.mrb[4].mxu1 }
 0x5a1   :  { %v1072_v5 = vadd.f32 %v1163_v62, %v1071_v29  ;;  %v1433_v6 = vpop.f32.mrb[5].mxu1 }
 0x5a3   :  { %1077 = vst [vmem:[%s2421_s9 + $0x10] sm:$0xff] %v1072_v5 }
 0x5a4   :  { %1082 = vsyncpa [#allocation5], 1 }
 0x5a5   :  { %1083 = vsyncpa [#allocation7], 1 }

</bundles_post_ra>
